<compile_context>
chip_gen: v5e
topology: v5e:2x2
jax: 0.10.0
libtpu: 0.0.40
codegen_flags: <defaults>
</compile_context>

<pallas_src>
import functools
import math

import jax
import jax.numpy as jnp
from jax import lax
from jax.experimental import pallas as pl
from jax.experimental.pallas import tpu as pltpu


# Tiling preferences (clamped to full dims for small shapes; full-dim blocks
# are always legal, and 256 / 512 keep (8,128)-divisibility at large shapes).
_ROW_TILE = 256        # tokens (B*S) per block
_VOCAB_TILE = 512      # vocab columns per block (multiple of 128)


def _row_tile(n):
    return n if n <= _ROW_TILE else _ROW_TILE


def _col_tile(n, pref=_VOCAB_TILE):
    return n if n <= pref else pref


# ----------------------------------------------------------------------------
# Pallas kernels
# ----------------------------------------------------------------------------

def _attn_block_kernel(xq_ref, xkv_ref, wq_ref, bq_ref, wkv_ref, bkv_ref,
                       madd_ref, wo_ref, bo_ref, g_ref, beta_ref,
                       o_ref, ctx_ref, *, n_heads):
    """One batch element: fused projections -> per-head attention -> output
    projection -> residual add -> LayerNorm.  bf16 MXU, f32 epilogues."""
    xq = xq_ref[0]                        # (Sq, D) f32  (also the residual)
    xkv = xkv_ref[0]                      # (Sk, D) f32
    D = xq.shape[-1]
    Dh = D // n_heads
    scale = 1.0 / math.sqrt(Dh)

    xq_b = xq.astype(jnp.bfloat16)
    xkv_b = xkv.astype(jnp.bfloat16)

    # Fused projections: Q from the query stream, [K|V] from the kv stream.
    q = jnp.dot(xq_b, wq_ref[...], preferred_element_type=jnp.float32) + bq_ref[...]
    kv = jnp.dot(xkv_b, wkv_ref[...], preferred_element_type=jnp.float32) + bkv_ref[...]
    k = kv[:, :D]
    v = kv[:, D:]

    madd = madd_ref[0]                    # (Sq, Sk) additive mask: 0 keep / -1e9 masked

    for h in range(n_heads):              # static unrolled per-head loop
        lo, hi = h * Dh, (h + 1) * Dh
        qh = q[:, lo:hi].astype(jnp.bfloat16)        # (Sq, Dh)
        kh = k[:, lo:hi].astype(jnp.bfloat16)        # (Sk, Dh)
        vh = v[:, lo:hi].astype(jnp.bfloat16)        # (Sk, Dh)
        # scores = q @ k^T / sqrt(Dh) + mask  (contraction over Dh, no transpose)
        s = lax.dot_general(qh, kh, (((1,), (1,)), ((), ())),
                            preferred_element_type=jnp.float32)
        s = s * scale + madd
        s = s - jnp.max(s, axis=-1, keepdims=True)
        p = jnp.exp(s)
        p = p * pl.reciprocal(jnp.sum(p, axis=-1, keepdims=True), approx=True)
        ctx_ref[:, lo:hi] = jnp.dot(p.astype(jnp.bfloat16), vh,
                                    preferred_element_type=jnp.float32)

    ctx = ctx_ref[...].astype(jnp.bfloat16)          # (Sq, D)
    out = jnp.dot(ctx, wo_ref[...], preferred_element_type=jnp.float32) + bo_ref[...]

    # residual add + LayerNorm (eps = 1e-5, nn.LayerNorm default), f32.
    y = out + xq
    mean = jnp.mean(y, axis=-1, keepdims=True)
    var = jnp.mean(jnp.square(y - mean), axis=-1, keepdims=True)
    yhat = (y - mean) * lax.rsqrt(var + 1e-5)
    o_ref[0] = yhat * g_ref[...] + beta_ref[...]


def _ffn_ln_kernel(x_ref, w1_ref, b1_ref, w2_ref, b2_ref, g_ref, beta_ref, o_ref):
    """relu(x@w1+b1)@w2+b2, then residual add + LayerNorm, on one row tile."""
    x = x_ref[...]                                                 # (TN, D) f32
    h = jnp.dot(x.astype(jnp.bfloat16), w1_ref[...],
                preferred_element_type=jnp.float32) + b1_ref[...]
    h = jnp.maximum(h, 0.0)
    # TODO(synk): dropout between the FFN linears omitted (eval mode / p = 0)
    f = jnp.dot(h.astype(jnp.bfloat16), w2_ref[...],
                preferred_element_type=jnp.float32) + b2_ref[...]
    y = f + x
    mean = jnp.mean(y, axis=-1, keepdims=True)
    var = jnp.mean(jnp.square(y - mean), axis=-1, keepdims=True)
    yhat = (y - mean) * lax.rsqrt(var + 1e-5)
    o_ref[...] = yhat * g_ref[...] + beta_ref[...]


def _linear_bias_kernel(x_ref, w_ref, b_ref, o_ref):
    o_ref[...] = (jnp.dot(x_ref[...].astype(jnp.bfloat16), w_ref[...],
                          preferred_element_type=jnp.float32) + b_ref[...])


# ----------------------------------------------------------------------------
# pallas_call wrappers
# ----------------------------------------------------------------------------

def attention_block(p, x_q, x_kv, mask_add, gamma, beta, n_heads):
    """Fused (attention + add&norm) sub-block.  x_q is also the residual."""
    B, Sq, D = x_q.shape
    Sk = x_kv.shape[1]
    kernel = functools.partial(_attn_block_kernel, n_heads=n_heads)
    return pl.pallas_call(
        kernel,
        out_shape=jax.ShapeDtypeStruct((B, Sq, D), jnp.float32),
        grid=(B,),
        in_specs=[
            pl.BlockSpec((1, Sq, D), lambda b: (b, 0, 0)),      # x_q / residual
            pl.BlockSpec((1, Sk, D), lambda b: (b, 0, 0)),      # x_kv
            pl.BlockSpec((D, D), lambda b: (0, 0)),             # wq   (bf16)
            pl.BlockSpec((1, D), lambda b: (0, 0)),             # bq
            pl.BlockSpec((D, 2 * D), lambda b: (0, 0)),         # wkv  (bf16)
            pl.BlockSpec((1, 2 * D), lambda b: (0, 0)),         # bkv
            pl.BlockSpec((1, Sq, Sk), lambda b: (b, 0, 0)),     # additive mask
            pl.BlockSpec((D, D), lambda b: (0, 0)),             # wo   (bf16)
            pl.BlockSpec((1, D), lambda b: (0, 0)),             # bo
            pl.BlockSpec((1, D), lambda b: (0, 0)),             # ln gamma
            pl.BlockSpec((1, D), lambda b: (0, 0)),             # ln beta
        ],
        out_specs=pl.BlockSpec((1, Sq, D), lambda b: (b, 0, 0)),
        scratch_shapes=[pltpu.VMEM((Sq, D), jnp.float32)],
        compiler_params=pltpu.CompilerParams(dimension_semantics=("parallel",)),
    )(x_q, x_kv, p["wq"], p["bq"].reshape(1, D),
      p["wkv"], p["bkv"].reshape(1, 2 * D), mask_add,
      p["wo"], p["bo"].reshape(1, D),
      gamma.reshape(1, D), beta.reshape(1, D))


def ffn_block(x, w1, b1, w2, b2, gamma, beta):
    """Fused (FFN + add&norm) sub-block, row-tiled over B*S."""
    B, S, D = x.shape
    N = B * S
    F = w1.shape[1]
    tn = _row_tile(N)
    out = pl.pallas_call(
        _ffn_ln_kernel,
        out_shape=jax.ShapeDtypeStruct((N, D), jnp.float32),
        grid=(pl.cdiv(N, tn),),
        in_specs=[
            pl.BlockSpec((tn, D), lambda i: (i, 0)),
            pl.BlockSpec((D, F), lambda i: (0, 0)),
            pl.BlockSpec((1, F), lambda i: (0, 0)),
            pl.BlockSpec((F, D), lambda i: (0, 0)),
            pl.BlockSpec((1, D), lambda i: (0, 0)),
            pl.BlockSpec((1, D), lambda i: (0, 0)),
            pl.BlockSpec((1, D), lambda i: (0, 0)),
        ],
        out_specs=pl.BlockSpec((tn, D), lambda i: (i, 0)),
        compiler_params=pltpu.CompilerParams(dimension_semantics=("parallel",)),
    )(x.reshape(N, D), w1, b1.reshape(1, F), w2, b2.reshape(1, D),
      gamma.reshape(1, D), beta.reshape(1, D))
    return out.reshape(B, S, D)


def logits_projection(x, w, b):
    """Final vocab projection, tiled over (row tiles, vocab tiles)."""
    B, S, D = x.shape
    N = B * S
    V = w.shape[1]
    tn = _row_tile(N)
    tv = _col_tile(V)
    out = pl.pallas_call(
        _linear_bias_kernel,
        out_shape=jax.ShapeDtypeStruct((N, V), jnp.float32),
        grid=(pl.cdiv(N, tn), pl.cdiv(V, tv)),
        in_specs=[
            pl.BlockSpec((tn, D), lambda i, j: (i, 0)),
            pl.BlockSpec((D, tv), lambda i, j: (0, j)),
            pl.BlockSpec((1, tv), lambda i, j: (0, j)),
        ],
        out_specs=pl.BlockSpec((tn, tv), lambda i, j: (i, j)),
        compiler_params=pltpu.CompilerParams(
            dimension_semantics=("parallel", "parallel")),
    )(x.reshape(N, D), w, b.reshape(1, V))
    return out.reshape(B, S, V)


# ----------------------------------------------------------------------------
# Module composition (glue in plain JAX, compute in the Pallas kernels above)
# ----------------------------------------------------------------------------

def decoder_block(lp, x, enc_src, trg_add, src_add, n_heads):
    # 1) masked self-attention + add & norm (one fused kernel)
    x = attention_block(lp["self_attn"], x, x, trg_add,
                        lp["ln1_g"], lp["ln1_b"], n_heads)
    # 2) encoder-decoder attention + add & norm (one fused kernel)
    x = attention_block(lp["cross_attn"], x, enc_src, src_add,
                        lp["ln2_g"], lp["ln2_b"], n_heads)
    # 3) position-wise FFN + add & norm (one fused kernel)
    x = ffn_block(x, lp["w1"], lp["b1"], lp["w2"], lp["b2"],
                  lp["ln3_g"], lp["ln3_b"])
    return x


def sinusoid_pos_encoding(max_len, d_model):
    pos = jnp.arange(max_len, dtype=jnp.float32)[:, None]
    i = jnp.arange(0, d_model, 2, dtype=jnp.float32)
    angle = pos / jnp.power(10000.0, i / d_model)
    pe = jnp.zeros((max_len, d_model), jnp.float32)
    pe = pe.at[:, 0::2].set(jnp.sin(angle))
    pe = pe.at[:, 1::2].set(jnp.cos(angle))
    return pe


@functools.partial(jax.jit, static_argnames=("n_heads",))
def decoder_forward(params, trg, enc_src, trg_mask, src_mask, *, n_heads):
    B, S = trg.shape
    tok = params["emb"][trg]                 # token-embedding gather (glue)
    pos = params["pos_enc"][:S]
    x = tok + pos[None]
    # TODO(synk): embedding / residual dropout omitted (eval mode, p = 0)

    # Additive masks (0 = keep, -1e9 = masked), equivalent to
    # masked_fill(mask == 0, -1e9); squeezed to (B, Sq, Sk) so the same tile
    # is shared by all heads (mask is DMA'd once per batch element).
    trg_add = jnp.where(trg_mask[:, 0] == 0, jnp.float32(-1e9), jnp.float32(0.0))
    src_add = jnp.where(src_mask[:, 0] == 0, jnp.float32(-1e9), jnp.float32(0.0))

    for lp in params["layers"]:
        x = decoder_block(lp, x, enc_src, trg_add, src_add, n_heads)
    return logits_projection(x, params["w_out"], params["b_out"])


# ----------------------------------------------------------------------------
# Deterministic parameter init (PyTorch-style), weights stored bf16 for MXU
# ----------------------------------------------------------------------------

def init_params(key, vocab, max_seq_len, d_model, ffn_hidden, n_layers, pad_idx):
    def dense(k, din, dout):
        # nn.Linear default: U(-1/sqrt(din), 1/sqrt(din)); stored as (din, dout)
        kw, kb = jax.random.split(k)
        lim = 1.0 / math.sqrt(din)
        w = jax.random.uniform(kw, (din, dout), jnp.float32, -lim, lim)
        b = jax.random.uniform(kb, (dout,), jnp.float32, -lim, lim)
        return w, b

    def attn_params(k):
        kq, kk, kv_, ko = jax.random.split(k, 4)
        wq, bq = dense(kq, d_model, d_model)
        wk, bk = dense(kk, d_model, d_model)
        wv, bv = dense(kv_, d_model, d_model)
        wo, bo = dense(ko, d_model, d_model)
        return {
            "wq": wq.astype(jnp.bfloat16), "bq": bq,
            "wkv": jnp.concatenate([wk, wv], axis=1).astype(jnp.bfloat16),
            "bkv": jnp.concatenate([bk, bv], axis=0),
            "wo": wo.astype(jnp.bfloat16), "bo": bo,
        }

    keys = jax.random.split(key, 2 + n_layers)
    emb = jax.random.normal(keys[0], (vocab, d_model), jnp.float32)
    emb = emb.at[pad_idx].set(0.0)           # padding_idx row is zero

    layers = []
    for li in range(n_layers):
        lk = jax.random.split(keys[2 + li], 4)
        w1, b1 = dense(lk[2], d_model, ffn_hidden)
        w2, b2 = dense(lk[3], ffn_hidden, d_model)
        layers.append({
            "self_attn": attn_params(lk[0]),
            "cross_attn": attn_params(lk[1]),
            "w1": w1.astype(jnp.bfloat16), "b1": b1,
            "w2": w2.astype(jnp.bfloat16), "b2": b2,
            "ln1_g": jnp.ones((d_model,), jnp.float32),
            "ln1_b": jnp.zeros((d_model,), jnp.float32),
            "ln2_g": jnp.ones((d_model,), jnp.float32),
            "ln2_b": jnp.zeros((d_model,), jnp.float32),
            "ln3_g": jnp.ones((d_model,), jnp.float32),
            "ln3_b": jnp.zeros((d_model,), jnp.float32),
        })

    w_out, b_out = dense(keys[1], d_model, vocab)
    return {
        "emb": emb,
        "pos_enc": sinusoid_pos_encoding(max_seq_len, d_model),
        "layers": layers,
        "w_out": w_out.astype(jnp.bfloat16),
        "b_out": b_out,
    }


# ----------------------------------------------------------------------------
# Demo
# ----------------------------------------------------------------------------

if __name__ == "__main__":
    B, S_trg, S_src = 2, 8, 8
    d_model, ffn_hidden, n_heads, n_layers = 32, 64, 4, 2
    trg_vocab, max_seq_len, pad_idx = 50, 16, 0

    key = jax.random.PRNGKey(0)
    kp, kt, ke, kpad = jax.random.split(key, 4)

    params = init_params(kp, trg_vocab, max_seq_len, d_model, ffn_hidden,
                         n_layers, pad_idx)

    # target tokens (with some pads at the end), encoder memory
    trg = jax.random.randint(kt, (B, S_trg), 1, trg_vocab, dtype=jnp.int32)
    trg = trg.at[:, -2:].set(pad_idx)
    enc_src = jax.random.normal(ke, (B, S_src, d_model), jnp.float32)

    # target mask: pad mask & causal mask -> (B, 1, S_trg, S_trg)
    trg_pad = (trg != pad_idx).astype(jnp.float32)[:, None, :, None]      # (B,1,S,1)
    causal = jnp.tril(jnp.ones((S_trg, S_trg), jnp.float32))[None, None]  # (1,1,S,S)
    trg_mask = trg_pad * causal                                           # (B,1,S,S)

    # source mask: pad mask over encoder positions, broadcast to (B,1,S_trg,S_src)
    src_valid = jnp.ones((B, S_src), jnp.float32).at[:, -1].set(0.0)
    src_mask = jnp.broadcast_to(src_valid[:, None, None, :], (B, 1, S_trg, S_src))

    out = decoder_forward(params, trg, enc_src, trg_mask, src_mask, n_heads=n_heads)
    out = jax.block_until_ready(out)

    assert out.shape == (B, S_trg, trg_vocab)
    assert bool(jnp.all(jnp.isfinite(out)))
    print("KERNEL_OK")
</pallas_src>

<mosaic_0001>
module attributes {stable_mosaic.version = 11 : i64} {
  func.func @_attn_block_kernel(%arg0: i32, %arg1: memref<1x8x32xf32, #tpu.memory_space<vmem>>, %arg2: memref<1x8x32xf32, #tpu.memory_space<vmem>>, %arg3: memref<32x32xbf16, #tpu.memory_space<vmem>>, %arg4: memref<1x32xf32, #tpu.memory_space<vmem>>, %arg5: memref<32x64xbf16, #tpu.memory_space<vmem>>, %arg6: memref<1x64xf32, #tpu.memory_space<vmem>>, %arg7: memref<1x8x8xf32, #tpu.memory_space<vmem>>, %arg8: memref<32x32xbf16, #tpu.memory_space<vmem>>, %arg9: memref<1x32xf32, #tpu.memory_space<vmem>>, %arg10: memref<1x32xf32, #tpu.memory_space<vmem>>, %arg11: memref<1x32xf32, #tpu.memory_space<vmem>>, %arg12: memref<1x8x32xf32, #tpu.memory_space<vmem>>, %arg13: memref<8x32xf32, #tpu.memory_space<vmem>>) attributes {dimension_semantics = [#tpu.dimension_semantics<parallel>], iteration_bounds = array<i64: 2>, scalar_prefetch = 0 : i64, scratch_operands = 1 : i64, tpu.core_type = #tpu.core_type<tc>, window_params = [{transform_indices = @transform_0, window_bounds = array<i64: 1, 8, 32>}, {transform_indices = @transform_1, window_bounds = array<i64: 1, 8, 32>}, {pipeline_mode = #tpu.pipeline_mode<synchronous>, transform_indices = @transform_2, window_bounds = array<i64: 32, 32>}, {pipeline_mode = #tpu.pipeline_mode<synchronous>, transform_indices = @transform_3, window_bounds = array<i64: 1, 32>}, {pipeline_mode = #tpu.pipeline_mode<synchronous>, transform_indices = @transform_4, window_bounds = array<i64: 32, 64>}, {pipeline_mode = #tpu.pipeline_mode<synchronous>, transform_indices = @transform_5, window_bounds = array<i64: 1, 64>}, {transform_indices = @transform_6, window_bounds = array<i64: 1, 8, 8>}, {pipeline_mode = #tpu.pipeline_mode<synchronous>, transform_indices = @transform_7, window_bounds = array<i64: 32, 32>}, {pipeline_mode = #tpu.pipeline_mode<synchronous>, transform_indices = @transform_8, window_bounds = array<i64: 1, 32>}, {pipeline_mode = #tpu.pipeline_mode<synchronous>, transform_indices = @transform_9, window_bounds = array<i64: 1, 32>}, {pipeline_mode = #tpu.pipeline_mode<synchronous>, transform_indices = @transform_10, window_bounds = array<i64: 1, 32>}, {transform_indices = @transform_11, window_bounds = array<i64: 1, 8, 32>}]} {
    %c0 = arith.constant 0 : index
    %c0_0 = arith.constant 0 : index
    %c0_1 = arith.constant 0 : index
    %0 = vector.load %arg1[%c0, %c0_0, %c0_1] : memref<1x8x32xf32, #tpu.memory_space<vmem>>, vector<1x8x32xf32>
    %1 = vector.shape_cast %0 : vector<1x8x32xf32> to vector<8x32xf32>
    %c0_2 = arith.constant 0 : index
    %c0_3 = arith.constant 0 : index
    %c0_4 = arith.constant 0 : index
    %2 = vector.load %arg2[%c0_2, %c0_3, %c0_4] : memref<1x8x32xf32, #tpu.memory_space<vmem>>, vector<1x8x32xf32>
    %3 = vector.shape_cast %2 : vector<1x8x32xf32> to vector<8x32xf32>
    %4 = arith.truncf %1 : vector<8x32xf32> to vector<8x32xbf16>
    %5 = arith.truncf %3 : vector<8x32xf32> to vector<8x32xbf16>
    %c0_5 = arith.constant 0 : index
    %c0_6 = arith.constant 0 : index
    %6 = vector.load %arg3[%c0_5, %c0_6] : memref<32x32xbf16, #tpu.memory_space<vmem>>, vector<32x32xbf16>
    %cst = arith.constant dense<0.000000e+00> : vector<8x32xf32>
    %7 = tpu.matmul %4, %6, %cst {dimension_numbers = #tpu.dot_dimension_numbers<[1], [0], [0], [1], [0, 0, 1, 1], [], []>} : vector<8x32xbf16>, vector<32x32xbf16>, vector<8x32xf32> -> vector<8x32xf32>
    %c0_7 = arith.constant 0 : index
    %c0_8 = arith.constant 0 : index
    %8 = vector.load %arg4[%c0_7, %c0_8] : memref<1x32xf32, #tpu.memory_space<vmem>>, vector<1x32xf32>
    %9 = vector.broadcast %8 : vector<1x32xf32> to vector<8x32xf32>
    %10 = arith.addf %7, %9 : vector<8x32xf32>
    %c0_9 = arith.constant 0 : index
    %c0_10 = arith.constant 0 : index
    %11 = vector.load %arg5[%c0_9, %c0_10] : memref<32x64xbf16, #tpu.memory_space<vmem>>, vector<32x64xbf16>
    %cst_11 = arith.constant dense<0.000000e+00> : vector<8x64xf32>
    %12 = tpu.matmul %5, %11, %cst_11 {dimension_numbers = #tpu.dot_dimension_numbers<[1], [0], [0], [1], [0, 0, 1, 1], [], []>} : vector<8x32xbf16>, vector<32x64xbf16>, vector<8x64xf32> -> vector<8x64xf32>
    %c0_12 = arith.constant 0 : index
    %c0_13 = arith.constant 0 : index
    %13 = vector.load %arg6[%c0_12, %c0_13] : memref<1x64xf32, #tpu.memory_space<vmem>>, vector<1x64xf32>
    %14 = vector.broadcast %13 : vector<1x64xf32> to vector<8x64xf32>
    %15 = arith.addf %12, %14 : vector<8x64xf32>
    %16 = vector.extract_strided_slice %15 {offsets = [0, 0], sizes = [8, 32], strides = [1, 1]} : vector<8x64xf32> to vector<8x32xf32>
    %17 = vector.extract_strided_slice %15 {offsets = [0, 32], sizes = [8, 32], strides = [1, 1]} : vector<8x64xf32> to vector<8x32xf32>
    %c0_14 = arith.constant 0 : index
    %c0_15 = arith.constant 0 : index
    %c0_16 = arith.constant 0 : index
    %18 = vector.load %arg7[%c0_14, %c0_15, %c0_16] : memref<1x8x8xf32, #tpu.memory_space<vmem>>, vector<1x8x8xf32>
    %19 = vector.shape_cast %18 : vector<1x8x8xf32> to vector<8x8xf32>
    %20 = vector.extract_strided_slice %10 {offsets = [0, 0], sizes = [8, 8], strides = [1, 1]} : vector<8x32xf32> to vector<8x8xf32>
    %21 = arith.truncf %20 : vector<8x8xf32> to vector<8x8xbf16>
    %22 = vector.extract_strided_slice %16 {offsets = [0, 0], sizes = [8, 8], strides = [1, 1]} : vector<8x32xf32> to vector<8x8xf32>
    %23 = arith.truncf %22 : vector<8x8xf32> to vector<8x8xbf16>
    %24 = vector.extract_strided_slice %17 {offsets = [0, 0], sizes = [8, 8], strides = [1, 1]} : vector<8x32xf32> to vector<8x8xf32>
    %25 = arith.truncf %24 : vector<8x8xf32> to vector<8x8xbf16>
    %cst_17 = arith.constant dense<0.000000e+00> : vector<8x8xf32>
    %26 = tpu.matmul %21, %23, %cst_17 {dimension_numbers = #tpu.dot_dimension_numbers<[1], [1], [0], [0], [0, 0, 1, 0], [], []>} : vector<8x8xbf16>, vector<8x8xbf16>, vector<8x8xf32> -> vector<8x8xf32>
    %cst_18 = arith.constant 0.353553385 : f32
    %27 = vector.broadcast %cst_18 : f32 to vector<8x8xf32>
    %28 = arith.mulf %26, %27 : vector<8x8xf32>
    %29 = arith.addf %28, %19 : vector<8x8xf32>
    %cst_19 = arith.constant dense<0xFF800000> : vector<8xf32>
    %30 = vector.multi_reduction <maximumf>, %29, %cst_19 [1] : vector<8x8xf32> to vector<8xf32>
    %31 = vector.shape_cast %30 : vector<8xf32> to vector<8x1xf32>
    %32 = vector.broadcast %31 : vector<8x1xf32> to vector<8x8xf32>
    %33 = arith.subf %29, %32 : vector<8x8xf32>
    %34 = math.exp %33 : vector<8x8xf32>
    %cst_20 = arith.constant dense<0.000000e+00> : vector<8xf32>
    %35 = vector.multi_reduction <add>, %34, %cst_20 [1] : vector<8x8xf32> to vector<8xf32>
    %36 = vector.shape_cast %35 : vector<8xf32> to vector<8x1xf32>
    %37 = tpu.reciprocal %36 {approx = true} : vector<8x1xf32> -> vector<8x1xf32>
    %38 = vector.broadcast %37 : vector<8x1xf32> to vector<8x8xf32>
    %39 = arith.mulf %34, %38 : vector<8x8xf32>
    %40 = arith.truncf %39 : vector<8x8xf32> to vector<8x8xbf16>
    %cst_21 = arith.constant dense<0.000000e+00> : vector<8x8xf32>
    %41 = tpu.matmul %40, %25, %cst_21 {dimension_numbers = #tpu.dot_dimension_numbers<[1], [0], [0], [1], [0, 0, 1, 1], [], []>} : vector<8x8xbf16>, vector<8x8xbf16>, vector<8x8xf32> -> vector<8x8xf32>
    %c0_22 = arith.constant 0 : index
    %c0_23 = arith.constant 0 : index
    %42 = vector.load %arg13[%c0_22, %c0_23] : memref<8x32xf32, #tpu.memory_space<vmem>>, vector<8x8xf32>
    tpu.vector_store %arg13[%c0_22, %c0_23], %41 {strides = array<i32>} : memref<8x32xf32, #tpu.memory_space<vmem>>, vector<8x8xf32>,
    %43 = vector.extract_strided_slice %10 {offsets = [0, 8], sizes = [8, 8], strides = [1, 1]} : vector<8x32xf32> to vector<8x8xf32>
    %44 = arith.truncf %43 : vector<8x8xf32> to vector<8x8xbf16>
    %45 = vector.extract_strided_slice %16 {offsets = [0, 8], sizes = [8, 8], strides = [1, 1]} : vector<8x32xf32> to vector<8x8xf32>
    %46 = arith.truncf %45 : vector<8x8xf32> to vector<8x8xbf16>
    %47 = vector.extract_strided_slice %17 {offsets = [0, 8], sizes = [8, 8], strides = [1, 1]} : vector<8x32xf32> to vector<8x8xf32>
    %48 = arith.truncf %47 : vector<8x8xf32> to vector<8x8xbf16>
    %cst_24 = arith.constant dense<0.000000e+00> : vector<8x8xf32>
    %49 = tpu.matmul %44, %46, %cst_24 {dimension_numbers = #tpu.dot_dimension_numbers<[1], [1], [0], [0], [0, 0, 1, 0], [], []>} : vector<8x8xbf16>, vector<8x8xbf16>, vector<8x8xf32> -> vector<8x8xf32>
    %cst_25 = arith.constant 0.353553385 : f32
    %50 = vector.broadcast %cst_25 : f32 to vector<8x8xf32>
    %51 = arith.mulf %49, %50 : vector<8x8xf32>
    %52 = arith.addf %51, %19 : vector<8x8xf32>
    %cst_26 = arith.constant dense<0xFF800000> : vector<8xf32>
    %53 = vector.multi_reduction <maximumf>, %52, %cst_26 [1] : vector<8x8xf32> to vector<8xf32>
    %54 = vector.shape_cast %53 : vector<8xf32> to vector<8x1xf32>
    %55 = vector.broadcast %54 : vector<8x1xf32> to vector<8x8xf32>
    %56 = arith.subf %52, %55 : vector<8x8xf32>
    %57 = math.exp %56 : vector<8x8xf32>
    %cst_27 = arith.constant dense<0.000000e+00> : vector<8xf32>
    %58 = vector.multi_reduction <add>, %57, %cst_27 [1] : vector<8x8xf32> to vector<8xf32>
    %59 = vector.shape_cast %58 : vector<8xf32> to vector<8x1xf32>
    %60 = tpu.reciprocal %59 {approx = true} : vector<8x1xf32> -> vector<8x1xf32>
    %61 = vector.broadcast %60 : vector<8x1xf32> to vector<8x8xf32>
    %62 = arith.mulf %57, %61 : vector<8x8xf32>
    %63 = arith.truncf %62 : vector<8x8xf32> to vector<8x8xbf16>
    %cst_28 = arith.constant dense<0.000000e+00> : vector<8x8xf32>
    %64 = tpu.matmul %63, %48, %cst_28 {dimension_numbers = #tpu.dot_dimension_numbers<[1], [0], [0], [1], [0, 0, 1, 1], [], []>} : vector<8x8xbf16>, vector<8x8xbf16>, vector<8x8xf32> -> vector<8x8xf32>
    %c0_29 = arith.constant 0 : index
    %c8 = arith.constant 8 : index
    %65 = vector.load %arg13[%c0_29, %c8] : memref<8x32xf32, #tpu.memory_space<vmem>>, vector<8x8xf32>
    tpu.vector_store %arg13[%c0_29, %c8], %64 {strides = array<i32>} : memref<8x32xf32, #tpu.memory_space<vmem>>, vector<8x8xf32>,
    %66 = vector.extract_strided_slice %10 {offsets = [0, 16], sizes = [8, 8], strides = [1, 1]} : vector<8x32xf32> to vector<8x8xf32>
    %67 = arith.truncf %66 : vector<8x8xf32> to vector<8x8xbf16>
    %68 = vector.extract_strided_slice %16 {offsets = [0, 16], sizes = [8, 8], strides = [1, 1]} : vector<8x32xf32> to vector<8x8xf32>
    %69 = arith.truncf %68 : vector<8x8xf32> to vector<8x8xbf16>
    %70 = vector.extract_strided_slice %17 {offsets = [0, 16], sizes = [8, 8], strides = [1, 1]} : vector<8x32xf32> to vector<8x8xf32>
    %71 = arith.truncf %70 : vector<8x8xf32> to vector<8x8xbf16>
    %cst_30 = arith.constant dense<0.000000e+00> : vector<8x8xf32>
    %72 = tpu.matmul %67, %69, %cst_30 {dimension_numbers = #tpu.dot_dimension_numbers<[1], [1], [0], [0], [0, 0, 1, 0], [], []>} : vector<8x8xbf16>, vector<8x8xbf16>, vector<8x8xf32> -> vector<8x8xf32>
    %cst_31 = arith.constant 0.353553385 : f32
    %73 = vector.broadcast %cst_31 : f32 to vector<8x8xf32>
    %74 = arith.mulf %72, %73 : vector<8x8xf32>
    %75 = arith.addf %74, %19 : vector<8x8xf32>
    %cst_32 = arith.constant dense<0xFF800000> : vector<8xf32>
    %76 = vector.multi_reduction <maximumf>, %75, %cst_32 [1] : vector<8x8xf32> to vector<8xf32>
    %77 = vector.shape_cast %76 : vector<8xf32> to vector<8x1xf32>
    %78 = vector.broadcast %77 : vector<8x1xf32> to vector<8x8xf32>
    %79 = arith.subf %75, %78 : vector<8x8xf32>
    %80 = math.exp %79 : vector<8x8xf32>
    %cst_33 = arith.constant dense<0.000000e+00> : vector<8xf32>
    %81 = vector.multi_reduction <add>, %80, %cst_33 [1] : vector<8x8xf32> to vector<8xf32>
    %82 = vector.shape_cast %81 : vector<8xf32> to vector<8x1xf32>
    %83 = tpu.reciprocal %82 {approx = true} : vector<8x1xf32> -> vector<8x1xf32>
    %84 = vector.broadcast %83 : vector<8x1xf32> to vector<8x8xf32>
    %85 = arith.mulf %80, %84 : vector<8x8xf32>
    %86 = arith.truncf %85 : vector<8x8xf32> to vector<8x8xbf16>
    %cst_34 = arith.constant dense<0.000000e+00> : vector<8x8xf32>
    %87 = tpu.matmul %86, %71, %cst_34 {dimension_numbers = #tpu.dot_dimension_numbers<[1], [0], [0], [1], [0, 0, 1, 1], [], []>} : vector<8x8xbf16>, vector<8x8xbf16>, vector<8x8xf32> -> vector<8x8xf32>
    %c0_35 = arith.constant 0 : index
    %c16 = arith.constant 16 : index
    %88 = vector.load %arg13[%c0_35, %c16] : memref<8x32xf32, #tpu.memory_space<vmem>>, vector<8x8xf32>
    tpu.vector_store %arg13[%c0_35, %c16], %87 {strides = array<i32>} : memref<8x32xf32, #tpu.memory_space<vmem>>, vector<8x8xf32>,
    %89 = vector.extract_strided_slice %10 {offsets = [0, 24], sizes = [8, 8], strides = [1, 1]} : vector<8x32xf32> to vector<8x8xf32>
    %90 = arith.truncf %89 : vector<8x8xf32> to vector<8x8xbf16>
    %91 = vector.extract_strided_slice %16 {offsets = [0, 24], sizes = [8, 8], strides = [1, 1]} : vector<8x32xf32> to vector<8x8xf32>
    %92 = arith.truncf %91 : vector<8x8xf32> to vector<8x8xbf16>
    %93 = vector.extract_strided_slice %17 {offsets = [0, 24], sizes = [8, 8], strides = [1, 1]} : vector<8x32xf32> to vector<8x8xf32>
    %94 = arith.truncf %93 : vector<8x8xf32> to vector<8x8xbf16>
    %cst_36 = arith.constant dense<0.000000e+00> : vector<8x8xf32>
    %95 = tpu.matmul %90, %92, %cst_36 {dimension_numbers = #tpu.dot_dimension_numbers<[1], [1], [0], [0], [0, 0, 1, 0], [], []>} : vector<8x8xbf16>, vector<8x8xbf16>, vector<8x8xf32> -> vector<8x8xf32>
    %cst_37 = arith.constant 0.353553385 : f32
    %96 = vector.broadcast %cst_37 : f32 to vector<8x8xf32>
    %97 = arith.mulf %95, %96 : vector<8x8xf32>
    %98 = arith.addf %97, %19 : vector<8x8xf32>
    %cst_38 = arith.constant dense<0xFF800000> : vector<8xf32>
    %99 = vector.multi_reduction <maximumf>, %98, %cst_38 [1] : vector<8x8xf32> to vector<8xf32>
    %100 = vector.shape_cast %99 : vector<8xf32> to vector<8x1xf32>
    %101 = vector.broadcast %100 : vector<8x1xf32> to vector<8x8xf32>
    %102 = arith.subf %98, %101 : vector<8x8xf32>
    %103 = math.exp %102 : vector<8x8xf32>
    %cst_39 = arith.constant dense<0.000000e+00> : vector<8xf32>
    %104 = vector.multi_reduction <add>, %103, %cst_39 [1] : vector<8x8xf32> to vector<8xf32>
    %105 = vector.shape_cast %104 : vector<8xf32> to vector<8x1xf32>
    %106 = tpu.reciprocal %105 {approx = true} : vector<8x1xf32> -> vector<8x1xf32>
    %107 = vector.broadcast %106 : vector<8x1xf32> to vector<8x8xf32>
    %108 = arith.mulf %103, %107 : vector<8x8xf32>
    %109 = arith.truncf %108 : vector<8x8xf32> to vector<8x8xbf16>
    %cst_40 = arith.constant dense<0.000000e+00> : vector<8x8xf32>
    %110 = tpu.matmul %109, %94, %cst_40 {dimension_numbers = #tpu.dot_dimension_numbers<[1], [0], [0], [1], [0, 0, 1, 1], [], []>} : vector<8x8xbf16>, vector<8x8xbf16>, vector<8x8xf32> -> vector<8x8xf32>
    %c0_41 = arith.constant 0 : index
    %c24 = arith.constant 24 : index
    %111 = vector.load %arg13[%c0_41, %c24] : memref<8x32xf32, #tpu.memory_space<vmem>>, vector<8x8xf32>
    tpu.vector_store %arg13[%c0_41, %c24], %110 {strides = array<i32>} : memref<8x32xf32, #tpu.memory_space<vmem>>, vector<8x8xf32>,
    %c0_42 = arith.constant 0 : index
    %c0_43 = arith.constant 0 : index
    %112 = vector.load %arg13[%c0_42, %c0_43] : memref<8x32xf32, #tpu.memory_space<vmem>>, vector<8x32xf32>
    %113 = arith.truncf %112 : vector<8x32xf32> to vector<8x32xbf16>
    %c0_44 = arith.constant 0 : index
    %c0_45 = arith.constant 0 : index
    %114 = vector.load %arg8[%c0_44, %c0_45] : memref<32x32xbf16, #tpu.memory_space<vmem>>, vector<32x32xbf16>
    %cst_46 = arith.constant dense<0.000000e+00> : vector<8x32xf32>
    %115 = tpu.matmul %113, %114, %cst_46 {dimension_numbers = #tpu.dot_dimension_numbers<[1], [0], [0], [1], [0, 0, 1, 1], [], []>} : vector<8x32xbf16>, vector<32x32xbf16>, vector<8x32xf32> -> vector<8x32xf32>
    %c0_47 = arith.constant 0 : index
    %c0_48 = arith.constant 0 : index
    %116 = vector.load %arg9[%c0_47, %c0_48] : memref<1x32xf32, #tpu.memory_space<vmem>>, vector<1x32xf32>
    %117 = vector.broadcast %116 : vector<1x32xf32> to vector<8x32xf32>
    %118 = arith.addf %115, %117 : vector<8x32xf32>
    %119 = arith.addf %118, %1 : vector<8x32xf32>
    %cst_49 = arith.constant dense<0.000000e+00> : vector<8xf32>
    %120 = vector.multi_reduction <add>, %119, %cst_49 [1] : vector<8x32xf32> to vector<8xf32>
    %121 = vector.shape_cast %120 : vector<8xf32> to vector<8x1xf32>
    %cst_50 = arith.constant 3.200000e+01 : f32
    %122 = vector.broadcast %cst_50 : f32 to vector<8x1xf32>
    %123 = arith.divf %121, %122 : vector<8x1xf32>
    %124 = vector.broadcast %123 : vector<8x1xf32> to vector<8x32xf32>
    %125 = arith.subf %119, %124 : vector<8x32xf32>
    %126 = arith.mulf %125, %125 : vector<8x32xf32>
    %cst_51 = arith.constant dense<0.000000e+00> : vector<8xf32>
    %127 = vector.multi_reduction <add>, %126, %cst_51 [1] : vector<8x32xf32> to vector<8xf32>
    %128 = vector.shape_cast %127 : vector<8xf32> to vector<8x1xf32>
    %cst_52 = arith.constant 3.200000e+01 : f32
    %129 = vector.broadcast %cst_52 : f32 to vector<8x1xf32>
    %130 = arith.divf %128, %129 : vector<8x1xf32>
    %131 = vector.broadcast %123 : vector<8x1xf32> to vector<8x32xf32>
    %132 = arith.subf %119, %131 : vector<8x32xf32>
    %cst_53 = arith.constant 9.99999974E-6 : f32
    %133 = vector.broadcast %cst_53 : f32 to vector<8x1xf32>
    %134 = arith.addf %130, %133 : vector<8x1xf32>
    %135 = math.rsqrt %134 : vector<8x1xf32>
    %136 = vector.broadcast %135 : vector<8x1xf32> to vector<8x32xf32>
    %137 = arith.mulf %132, %136 : vector<8x32xf32>
    %c0_54 = arith.constant 0 : index
    %c0_55 = arith.constant 0 : index
    %138 = vector.load %arg10[%c0_54, %c0_55] : memref<1x32xf32, #tpu.memory_space<vmem>>, vector<1x32xf32>
    %139 = vector.broadcast %138 : vector<1x32xf32> to vector<8x32xf32>
    %140 = arith.mulf %137, %139 : vector<8x32xf32>
    %c0_56 = arith.constant 0 : index
    %c0_57 = arith.constant 0 : index
    %141 = vector.load %arg11[%c0_56, %c0_57] : memref<1x32xf32, #tpu.memory_space<vmem>>, vector<1x32xf32>
    %142 = vector.broadcast %141 : vector<1x32xf32> to vector<8x32xf32>
    %143 = arith.addf %140, %142 : vector<8x32xf32>
    %c0_58 = arith.constant 0 : index
    %c0_59 = arith.constant 0 : index
    %c0_60 = arith.constant 0 : index
    %144 = vector.load %arg12[%c0_58, %c0_59, %c0_60] : memref<1x8x32xf32, #tpu.memory_space<vmem>>, vector<1x8x32xf32>
    %145 = vector.shape_cast %144 : vector<1x8x32xf32> to vector<8x32xf32>
    %146 = vector.shape_cast %143 : vector<8x32xf32> to vector<1x8x32xf32>
    tpu.vector_store %arg12[%c0_58, %c0_59, %c0_60], %146 {strides = array<i32>} : memref<1x8x32xf32, #tpu.memory_space<vmem>>, vector<1x8x32xf32>,
    return
  }
  func.func @transform_0(%arg0: i32) -> (i32, i32, i32) {
    %c0_i32 = arith.constant 0 : i32
    %c0_i32_0 = arith.constant 0 : i32
    %c0_i32_1 = arith.constant 0 : i32
    return %arg0, %c0_i32, %c0_i32_0 : i32, i32, i32
  }
  func.func @transform_1(%arg0: i32) -> (i32, i32, i32) {
    %c0_i32 = arith.constant 0 : i32
    %c0_i32_0 = arith.constant 0 : i32
    %c0_i32_1 = arith.constant 0 : i32
    return %arg0, %c0_i32, %c0_i32_0 : i32, i32, i32
  }
  func.func @transform_2(%arg0: i32) -> (i32, i32) {
    %c0_i32 = arith.constant 0 : i32
    %c0_i32_0 = arith.constant 0 : i32
    %c0_i32_1 = arith.constant 0 : i32
    return %c0_i32, %c0_i32_0 : i32, i32
  }
  func.func @transform_3(%arg0: i32) -> (i32, i32) {
    %c0_i32 = arith.constant 0 : i32
    %c0_i32_0 = arith.constant 0 : i32
    %c0_i32_1 = arith.constant 0 : i32
    return %c0_i32, %c0_i32_0 : i32, i32
  }
  func.func @transform_4(%arg0: i32) -> (i32, i32) {
    %c0_i32 = arith.constant 0 : i32
    %c0_i32_0 = arith.constant 0 : i32
    %c0_i32_1 = arith.constant 0 : i32
    return %c0_i32, %c0_i32_0 : i32, i32
  }
  func.func @transform_5(%arg0: i32) -> (i32, i32) {
    %c0_i32 = arith.constant 0 : i32
    %c0_i32_0 = arith.constant 0 : i32
    %c0_i32_1 = arith.constant 0 : i32
    return %c0_i32, %c0_i32_0 : i32, i32
  }
  func.func @transform_6(%arg0: i32) -> (i32, i32, i32) {
    %c0_i32 = arith.constant 0 : i32
    %c0_i32_0 = arith.constant 0 : i32
    %c0_i32_1 = arith.constant 0 : i32
    return %arg0, %c0_i32, %c0_i32_0 : i32, i32, i32
  }
  func.func @transform_7(%arg0: i32) -> (i32, i32) {
    %c0_i32 = arith.constant 0 : i32
    %c0_i32_0 = arith.constant 0 : i32
    %c0_i32_1 = arith.constant 0 : i32
    return %c0_i32, %c0_i32_0 : i32, i32
  }
  func.func @transform_8(%arg0: i32) -> (i32, i32) {
    %c0_i32 = arith.constant 0 : i32
    %c0_i32_0 = arith.constant 0 : i32
    %c0_i32_1 = arith.constant 0 : i32
    return %c0_i32, %c0_i32_0 : i32, i32
  }
  func.func @transform_9(%arg0: i32) -> (i32, i32) {
    %c0_i32 = arith.constant 0 : i32
    %c0_i32_0 = arith.constant 0 : i32
    %c0_i32_1 = arith.constant 0 : i32
    return %c0_i32, %c0_i32_0 : i32, i32
  }
  func.func @transform_10(%arg0: i32) -> (i32, i32) {
    %c0_i32 = arith.constant 0 : i32
    %c0_i32_0 = arith.constant 0 : i32
    %c0_i32_1 = arith.constant 0 : i32
    return %c0_i32, %c0_i32_0 : i32, i32
  }
  func.func @transform_11(%arg0: i32) -> (i32, i32, i32) {
    %c0_i32 = arith.constant 0 : i32
    %c0_i32_0 = arith.constant 0 : i32
    %c0_i32_1 = arith.constant 0 : i32
    return %arg0, %c0_i32, %c0_i32_0 : i32, i32, i32
  }
}

module attributes {stable_mosaic.version = 11 : i64} {
  func.func @_ffn_ln_kernel(%arg0: i32, %arg1: memref<16x32xf32, #tpu.memory_space<vmem>>, %arg2: memref<32x64xbf16, #tpu.memory_space<vmem>>, %arg3: memref<1x64xf32, #tpu.memory_space<vmem>>, %arg4: memref<64x32xbf16, #tpu.memory_space<vmem>>, %arg5: memref<1x32xf32, #tpu.memory_space<vmem>>, %arg6: memref<1x32xf32, #tpu.memory_space<vmem>>, %arg7: memref<1x32xf32, #tpu.memory_space<vmem>>, %arg8: memref<16x32xf32, #tpu.memory_space<vmem>>) attributes {dimension_semantics = [#tpu.dimension_semantics<parallel>], iteration_bounds = array<i64: 1>, scalar_prefetch = 0 : i64, scratch_operands = 0 : i64, tpu.core_type = #tpu.core_type<tc>, window_params = [{transform_indices = @transform_0, window_bounds = array<i64: 16, 32>}, {pipeline_mode = #tpu.pipeline_mode<synchronous>, transform_indices = @transform_1, window_bounds = array<i64: 32, 64>}, {pipeline_mode = #tpu.pipeline_mode<synchronous>, transform_indices = @transform_2, window_bounds = array<i64: 1, 64>}, {pipeline_mode = #tpu.pipeline_mode<synchronous>, transform_indices = @transform_3, window_bounds = array<i64: 64, 32>}, {pipeline_mode = #tpu.pipeline_mode<synchronous>, transform_indices = @transform_4, window_bounds = array<i64: 1, 32>}, {pipeline_mode = #tpu.pipeline_mode<synchronous>, transform_indices = @transform_5, window_bounds = array<i64: 1, 32>}, {pipeline_mode = #tpu.pipeline_mode<synchronous>, transform_indices = @transform_6, window_bounds = array<i64: 1, 32>}, {transform_indices = @transform_7, window_bounds = array<i64: 16, 32>}]} {
    %c0 = arith.constant 0 : index
    %c0_0 = arith.constant 0 : index
    %0 = vector.load %arg1[%c0, %c0_0] : memref<16x32xf32, #tpu.memory_space<vmem>>, vector<16x32xf32>
    %1 = arith.truncf %0 : vector<16x32xf32> to vector<16x32xbf16>
    %c0_1 = arith.constant 0 : index
    %c0_2 = arith.constant 0 : index
    %2 = vector.load %arg2[%c0_1, %c0_2] : memref<32x64xbf16, #tpu.memory_space<vmem>>, vector<32x64xbf16>
    %cst = arith.constant dense<0.000000e+00> : vector<16x64xf32>
    %3 = tpu.matmul %1, %2, %cst {dimension_numbers = #tpu.dot_dimension_numbers<[1], [0], [0], [1], [0, 0, 1, 1], [], []>} : vector<16x32xbf16>, vector<32x64xbf16>, vector<16x64xf32> -> vector<16x64xf32>
    %c0_3 = arith.constant 0 : index
    %c0_4 = arith.constant 0 : index
    %4 = vector.load %arg3[%c0_3, %c0_4] : memref<1x64xf32, #tpu.memory_space<vmem>>, vector<1x64xf32>
    %5 = vector.broadcast %4 : vector<1x64xf32> to vector<16x64xf32>
    %6 = arith.addf %3, %5 : vector<16x64xf32>
    %cst_5 = arith.constant 0.000000e+00 : f32
    %7 = vector.broadcast %cst_5 : f32 to vector<16x64xf32>
    %8 = arith.maximumf %6, %7 : vector<16x64xf32>
    %9 = arith.truncf %8 : vector<16x64xf32> to vector<16x64xbf16>
    %c0_6 = arith.constant 0 : index
    %c0_7 = arith.constant 0 : index
    %10 = vector.load %arg4[%c0_6, %c0_7] : memref<64x32xbf16, #tpu.memory_space<vmem>>, vector<64x32xbf16>
    %cst_8 = arith.constant dense<0.000000e+00> : vector<16x32xf32>
    %11 = tpu.matmul %9, %10, %cst_8 {dimension_numbers = #tpu.dot_dimension_numbers<[1], [0], [0], [1], [0, 0, 1, 1], [], []>} : vector<16x64xbf16>, vector<64x32xbf16>, vector<16x32xf32> -> vector<16x32xf32>
    %c0_9 = arith.constant 0 : index
    %c0_10 = arith.constant 0 : index
    %12 = vector.load %arg5[%c0_9, %c0_10] : memref<1x32xf32, #tpu.memory_space<vmem>>, vector<1x32xf32>
    %13 = vector.broadcast %12 : vector<1x32xf32> to vector<16x32xf32>
    %14 = arith.addf %11, %13 : vector<16x32xf32>
    %15 = arith.addf %14, %0 : vector<16x32xf32>
    %cst_11 = arith.constant dense<0.000000e+00> : vector<16xf32>
    %16 = vector.multi_reduction <add>, %15, %cst_11 [1] : vector<16x32xf32> to vector<16xf32>
    %17 = vector.shape_cast %16 : vector<16xf32> to vector<16x1xf32>
    %cst_12 = arith.constant 3.200000e+01 : f32
    %18 = vector.broadcast %cst_12 : f32 to vector<16x1xf32>
    %19 = arith.divf %17, %18 : vector<16x1xf32>
    %20 = vector.broadcast %19 : vector<16x1xf32> to vector<16x32xf32>
    %21 = arith.subf %15, %20 : vector<16x32xf32>
    %22 = arith.mulf %21, %21 : vector<16x32xf32>
    %cst_13 = arith.constant dense<0.000000e+00> : vector<16xf32>
    %23 = vector.multi_reduction <add>, %22, %cst_13 [1] : vector<16x32xf32> to vector<16xf32>
    %24 = vector.shape_cast %23 : vector<16xf32> to vector<16x1xf32>
    %cst_14 = arith.constant 3.200000e+01 : f32
    %25 = vector.broadcast %cst_14 : f32 to vector<16x1xf32>
    %26 = arith.divf %24, %25 : vector<16x1xf32>
    %27 = vector.broadcast %19 : vector<16x1xf32> to vector<16x32xf32>
    %28 = arith.subf %15, %27 : vector<16x32xf32>
    %cst_15 = arith.constant 9.99999974E-6 : f32
    %29 = vector.broadcast %cst_15 : f32 to vector<16x1xf32>
    %30 = arith.addf %26, %29 : vector<16x1xf32>
    %31 = math.rsqrt %30 : vector<16x1xf32>
    %32 = vector.broadcast %31 : vector<16x1xf32> to vector<16x32xf32>
    %33 = arith.mulf %28, %32 : vector<16x32xf32>
    %c0_16 = arith.constant 0 : index
    %c0_17 = arith.constant 0 : index
    %34 = vector.load %arg6[%c0_16, %c0_17] : memref<1x32xf32, #tpu.memory_space<vmem>>, vector<1x32xf32>
    %35 = vector.broadcast %34 : vector<1x32xf32> to vector<16x32xf32>
    %36 = arith.mulf %33, %35 : vector<16x32xf32>
    %c0_18 = arith.constant 0 : index
    %c0_19 = arith.constant 0 : index
    %37 = vector.load %arg7[%c0_18, %c0_19] : memref<1x32xf32, #tpu.memory_space<vmem>>, vector<1x32xf32>
    %38 = vector.broadcast %37 : vector<1x32xf32> to vector<16x32xf32>
    %39 = arith.addf %36, %38 : vector<16x32xf32>
    %c0_20 = arith.constant 0 : index
    %c0_21 = arith.constant 0 : index
    %40 = vector.load %arg8[%c0_20, %c0_21] : memref<16x32xf32, #tpu.memory_space<vmem>>, vector<16x32xf32>
    tpu.vector_store %arg8[%c0_20, %c0_21], %39 {strides = array<i32>} : memref<16x32xf32, #tpu.memory_space<vmem>>, vector<16x32xf32>,
    return
  }
  func.func @transform_0(%arg0: i32) -> (i32, i32) {
    %c0_i32 = arith.constant 0 : i32
    %c0_i32_0 = arith.constant 0 : i32
    return %arg0, %c0_i32 : i32, i32
  }
  func.func @transform_1(%arg0: i32) -> (i32, i32) {
    %c0_i32 = arith.constant 0 : i32
    %c0_i32_0 = arith.constant 0 : i32
    %c0_i32_1 = arith.constant 0 : i32
    return %c0_i32, %c0_i32_0 : i32, i32
  }
  func.func @transform_2(%arg0: i32) -> (i32, i32) {
    %c0_i32 = arith.constant 0 : i32
    %c0_i32_0 = arith.constant 0 : i32
    %c0_i32_1 = arith.constant 0 : i32
    return %c0_i32, %c0_i32_0 : i32, i32
  }
  func.func @transform_3(%arg0: i32) -> (i32, i32) {
    %c0_i32 = arith.constant 0 : i32
    %c0_i32_0 = arith.constant 0 : i32
    %c0_i32_1 = arith.constant 0 : i32
    return %c0_i32, %c0_i32_0 : i32, i32
  }
  func.func @transform_4(%arg0: i32) -> (i32, i32) {
    %c0_i32 = arith.constant 0 : i32
    %c0_i32_0 = arith.constant 0 : i32
    %c0_i32_1 = arith.constant 0 : i32
    return %c0_i32, %c0_i32_0 : i32, i32
  }
  func.func @transform_5(%arg0: i32) -> (i32, i32) {
    %c0_i32 = arith.constant 0 : i32
    %c0_i32_0 = arith.constant 0 : i32
    %c0_i32_1 = arith.constant 0 : i32
    return %c0_i32, %c0_i32_0 : i32, i32
  }
  func.func @transform_6(%arg0: i32) -> (i32, i32) {
    %c0_i32 = arith.constant 0 : i32
    %c0_i32_0 = arith.constant 0 : i32
    %c0_i32_1 = arith.constant 0 : i32
    return %c0_i32, %c0_i32_0 : i32, i32
  }
  func.func @transform_7(%arg0: i32) -> (i32, i32) {
    %c0_i32 = arith.constant 0 : i32
    %c0_i32_0 = arith.constant 0 : i32
    return %arg0, %c0_i32 : i32, i32
  }
}

module attributes {stable_mosaic.version = 11 : i64} {
  func.func @_linear_bias_kernel(%arg0: i32, %arg1: i32, %arg2: memref<16x32xf32, #tpu.memory_space<vmem>>, %arg3: memref<32x50xbf16, #tpu.memory_space<vmem>>, %arg4: memref<1x50xf32, #tpu.memory_space<vmem>>, %arg5: memref<16x50xf32, #tpu.memory_space<vmem>>) attributes {dimension_semantics = [#tpu.dimension_semantics<parallel>, #tpu.dimension_semantics<parallel>], iteration_bounds = array<i64: 1, 1>, scalar_prefetch = 0 : i64, scratch_operands = 0 : i64, tpu.core_type = #tpu.core_type<tc>, window_params = [{transform_indices = @transform_0, window_bounds = array<i64: 16, 32>}, {transform_indices = @transform_1, window_bounds = array<i64: 32, 50>}, {transform_indices = @transform_2, window_bounds = array<i64: 1, 50>}, {transform_indices = @transform_3, window_bounds = array<i64: 16, 50>}]} {
    %c0 = arith.constant 0 : index
    %c0_0 = arith.constant 0 : index
    %0 = vector.load %arg2[%c0, %c0_0] : memref<16x32xf32, #tpu.memory_space<vmem>>, vector<16x32xf32>
    %1 = arith.truncf %0 : vector<16x32xf32> to vector<16x32xbf16>
    %c0_1 = arith.constant 0 : index
    %c0_2 = arith.constant 0 : index
    %2 = vector.load %arg3[%c0_1, %c0_2] : memref<32x50xbf16, #tpu.memory_space<vmem>>, vector<32x50xbf16>
    %cst = arith.constant dense<0.000000e+00> : vector<16x50xf32>
    %3 = tpu.matmul %1, %2, %cst {dimension_numbers = #tpu.dot_dimension_numbers<[1], [0], [0], [1], [0, 0, 1, 1], [], []>} : vector<16x32xbf16>, vector<32x50xbf16>, vector<16x50xf32> -> vector<16x50xf32>
    %c0_3 = arith.constant 0 : index
    %c0_4 = arith.constant 0 : index
    %4 = vector.load %arg4[%c0_3, %c0_4] : memref<1x50xf32, #tpu.memory_space<vmem>>, vector<1x50xf32>
    %5 = vector.broadcast %4 : vector<1x50xf32> to vector<16x50xf32>
    %6 = arith.addf %3, %5 : vector<16x50xf32>
    %c0_5 = arith.constant 0 : index
    %c0_6 = arith.constant 0 : index
    %7 = vector.load %arg5[%c0_5, %c0_6] : memref<16x50xf32, #tpu.memory_space<vmem>>, vector<16x50xf32>
    tpu.vector_store %arg5[%c0_5, %c0_6], %6 {strides = array<i32>} : memref<16x50xf32, #tpu.memory_space<vmem>>, vector<16x50xf32>,
    return
  }
  func.func @transform_0(%arg0: i32, %arg1: i32) -> (i32, i32) {
    %c0_i32 = arith.constant 0 : i32
    %c0_i32_0 = arith.constant 0 : i32
    return %arg0, %c0_i32 : i32, i32
  }
  func.func @transform_1(%arg0: i32, %arg1: i32) -> (i32, i32) {
    %c0_i32 = arith.constant 0 : i32
    %c0_i32_0 = arith.constant 0 : i32
    return %c0_i32, %arg1 : i32, i32
  }
  func.func @transform_2(%arg0: i32, %arg1: i32) -> (i32, i32) {
    %c0_i32 = arith.constant 0 : i32
    %c0_i32_0 = arith.constant 0 : i32
    return %c0_i32, %arg1 : i32, i32
  }
  func.func @transform_3(%arg0: i32, %arg1: i32) -> (i32, i32) {
    %c0_i32 = arith.constant 0 : i32
    return %arg0, %arg1 : i32, i32
  }
}

module attributes {stable_mosaic.version = 11 : i64} {
  func.func @_attn_block_kernel(%arg0: i32, %arg1: memref<1x8x32xf32, #tpu.memory_space<vmem>>, %arg2: memref<1x8x32xf32, #tpu.memory_space<vmem>>, %arg3: memref<32x32xbf16, #tpu.memory_space<vmem>>, %arg4: memref<1x32xf32, #tpu.memory_space<vmem>>, %arg5: memref<32x64xbf16, #tpu.memory_space<vmem>>, %arg6: memref<1x64xf32, #tpu.memory_space<vmem>>, %arg7: memref<1x8x8xf32, #tpu.memory_space<vmem>>, %arg8: memref<32x32xbf16, #tpu.memory_space<vmem>>, %arg9: memref<1x32xf32, #tpu.memory_space<vmem>>, %arg10: memref<1x32xf32, #tpu.memory_space<vmem>>, %arg11: memref<1x32xf32, #tpu.memory_space<vmem>>, %arg12: memref<1x8x32xf32, #tpu.memory_space<vmem>>, %arg13: memref<8x32xf32, #tpu.memory_space<vmem>>) attributes {dimension_semantics = [#tpu.dimension_semantics<parallel>], iteration_bounds = array<i64: 2>, scalar_prefetch = 0 : i64, scratch_operands = 1 : i64, tpu.core_type = #tpu.core_type<tc>, window_params = [{transform_indices = @transform_0, window_bounds = array<i64: 1, 8, 32>}, {transform_indices = @transform_1, window_bounds = array<i64: 1, 8, 32>}, {pipeline_mode = #tpu.pipeline_mode<synchronous>, transform_indices = @transform_2, window_bounds = array<i64: 32, 32>}, {pipeline_mode = #tpu.pipeline_mode<synchronous>, transform_indices = @transform_3, window_bounds = array<i64: 1, 32>}, {pipeline_mode = #tpu.pipeline_mode<synchronous>, transform_indices = @transform_4, window_bounds = array<i64: 32, 64>}, {pipeline_mode = #tpu.pipeline_mode<synchronous>, transform_indices = @transform_5, window_bounds = array<i64: 1, 64>}, {transform_indices = @transform_6, window_bounds = array<i64: 1, 8, 8>}, {pipeline_mode = #tpu.pipeline_mode<synchronous>, transform_indices = @transform_7, window_bounds = array<i64: 32, 32>}, {pipeline_mode = #tpu.pipeline_mode<synchronous>, transform_indices = @transform_8, window_bounds = array<i64: 1, 32>}, {pipeline_mode = #tpu.pipeline_mode<synchronous>, transform_indices = @transform_9, window_bounds = array<i64: 1, 32>}, {pipeline_mode = #tpu.pipeline_mode<synchronous>, transform_indices = @transform_10, window_bounds = array<i64: 1, 32>}, {transform_indices = @transform_11, window_bounds = array<i64: 1, 8, 32>}]} {
    %c0 = arith.constant 0 : index
    %c0_0 = arith.constant 0 : index
    %c0_1 = arith.constant 0 : index
    %0 = vector.load %arg1[%c0, %c0_0, %c0_1] : memref<1x8x32xf32, #tpu.memory_space<vmem>>, vector<1x8x32xf32>
    %1 = vector.shape_cast %0 : vector<1x8x32xf32> to vector<8x32xf32>
    %c0_2 = arith.constant 0 : index
    %c0_3 = arith.constant 0 : index
    %c0_4 = arith.constant 0 : index
    %2 = vector.load %arg2[%c0_2, %c0_3, %c0_4] : memref<1x8x32xf32, #tpu.memory_space<vmem>>, vector<1x8x32xf32>
    %3 = vector.shape_cast %2 : vector<1x8x32xf32> to vector<8x32xf32>
    %4 = arith.truncf %1 : vector<8x32xf32> to vector<8x32xbf16>
    %5 = arith.truncf %3 : vector<8x32xf32> to vector<8x32xbf16>
    %c0_5 = arith.constant 0 : index
    %c0_6 = arith.constant 0 : index
    %6 = vector.load %arg3[%c0_5, %c0_6] : memref<32x32xbf16, #tpu.memory_space<vmem>>, vector<32x32xbf16>
    %cst = arith.constant dense<0.000000e+00> : vector<8x32xf32>
    %7 = tpu.matmul %4, %6, %cst {dimension_numbers = #tpu.dot_dimension_numbers<[1], [0], [0], [1], [0, 0, 1, 1], [], []>} : vector<8x32xbf16>, vector<32x32xbf16>, vector<8x32xf32> -> vector<8x32xf32>
    %c0_7 = arith.constant 0 : index
    %c0_8 = arith.constant 0 : index
    %8 = vector.load %arg4[%c0_7, %c0_8] : memref<1x32xf32, #tpu.memory_space<vmem>>, vector<1x32xf32>
    %9 = vector.broadcast %8 : vector<1x32xf32> to vector<8x32xf32>
    %10 = arith.addf %7, %9 : vector<8x32xf32>
    %c0_9 = arith.constant 0 : index
    %c0_10 = arith.constant 0 : index
    %11 = vector.load %arg5[%c0_9, %c0_10] : memref<32x64xbf16, #tpu.memory_space<vmem>>, vector<32x64xbf16>
    %cst_11 = arith.constant dense<0.000000e+00> : vector<8x64xf32>
    %12 = tpu.matmul %5, %11, %cst_11 {dimension_numbers = #tpu.dot_dimension_numbers<[1], [0], [0], [1], [0, 0, 1, 1], [], []>} : vector<8x32xbf16>, vector<32x64xbf16>, vector<8x64xf32> -> vector<8x64xf32>
    %c0_12 = arith.constant 0 : index
    %c0_13 = arith.constant 0 : index
    %13 = vector.load %arg6[%c0_12, %c0_13] : memref<1x64xf32, #tpu.memory_space<vmem>>, vector<1x64xf32>
    %14 = vector.broadcast %13 : vector<1x64xf32> to vector<8x64xf32>
    %15 = arith.addf %12, %14 : vector<8x64xf32>
    %16 = vector.extract_strided_slice %15 {offsets = [0, 0], sizes = [8, 32], strides = [1, 1]} : vector<8x64xf32> to vector<8x32xf32>
    %17 = vector.extract_strided_slice %15 {offsets = [0, 32], sizes = [8, 32], strides = [1, 1]} : vector<8x64xf32> to vector<8x32xf32>
    %c0_14 = arith.constant 0 : index
    %c0_15 = arith.constant 0 : index
    %c0_16 = arith.constant 0 : index
    %18 = vector.load %arg7[%c0_14, %c0_15, %c0_16] : memref<1x8x8xf32, #tpu.memory_space<vmem>>, vector<1x8x8xf32>
    %19 = vector.shape_cast %18 : vector<1x8x8xf32> to vector<8x8xf32>
    %20 = vector.extract_strided_slice %10 {offsets = [0, 0], sizes = [8, 8], strides = [1, 1]} : vector<8x32xf32> to vector<8x8xf32>
    %21 = arith.truncf %20 : vector<8x8xf32> to vector<8x8xbf16>
    %22 = vector.extract_strided_slice %16 {offsets = [0, 0], sizes = [8, 8], strides = [1, 1]} : vector<8x32xf32> to vector<8x8xf32>
    %23 = arith.truncf %22 : vector<8x8xf32> to vector<8x8xbf16>
    %24 = vector.extract_strided_slice %17 {offsets = [0, 0], sizes = [8, 8], strides = [1, 1]} : vector<8x32xf32> to vector<8x8xf32>
    %25 = arith.truncf %24 : vector<8x8xf32> to vector<8x8xbf16>
    %cst_17 = arith.constant dense<0.000000e+00> : vector<8x8xf32>
    %26 = tpu.matmul %21, %23, %cst_17 {dimension_numbers = #tpu.dot_dimension_numbers<[1], [1], [0], [0], [0, 0, 1, 0], [], []>} : vector<8x8xbf16>, vector<8x8xbf16>, vector<8x8xf32> -> vector<8x8xf32>
    %cst_18 = arith.constant 0.353553385 : f32
    %27 = vector.broadcast %cst_18 : f32 to vector<8x8xf32>
    %28 = arith.mulf %26, %27 : vector<8x8xf32>
    %29 = arith.addf %28, %19 : vector<8x8xf32>
    %cst_19 = arith.constant dense<0xFF800000> : vector<8xf32>
    %30 = vector.multi_reduction <maximumf>, %29, %cst_19 [1] : vector<8x8xf32> to vector<8xf32>
    %31 = vector.shape_cast %30 : vector<8xf32> to vector<8x1xf32>
    %32 = vector.broadcast %31 : vector<8x1xf32> to vector<8x8xf32>
    %33 = arith.subf %29, %32 : vector<8x8xf32>
    %34 = math.exp %33 : vector<8x8xf32>
    %cst_20 = arith.constant dense<0.000000e+00> : vector<8xf32>
    %35 = vector.multi_reduction <add>, %34, %cst_20 [1] : vector<8x8xf32> to vector<8xf32>
    %36 = vector.shape_cast %35 : vector<8xf32> to vector<8x1xf32>
    %37 = tpu.reciprocal %36 {approx = true} : vector<8x1xf32> -> vector<8x1xf32>
    %38 = vector.broadcast %37 : vector<8x1xf32> to vector<8x8xf32>
    %39 = arith.mulf %34, %38 : vector<8x8xf32>
    %40 = arith.truncf %39 : vector<8x8xf32> to vector<8x8xbf16>
    %cst_21 = arith.constant dense<0.000000e+00> : vector<8x8xf32>
    %41 = tpu.matmul %40, %25, %cst_21 {dimension_numbers = #tpu.dot_dimension_numbers<[1], [0], [0], [1], [0, 0, 1, 1], [], []>} : vector<8x8xbf16>, vector<8x8xbf16>, vector<8x8xf32> -> vector<8x8xf32>
    %c0_22 = arith.constant 0 : index
    %c0_23 = arith.constant 0 : index
    %42 = vector.load %arg13[%c0_22, %c0_23] : memref<8x32xf32, #tpu.memory_space<vmem>>, vector<8x8xf32>
    tpu.vector_store %arg13[%c0_22, %c0_23], %41 {strides = array<i32>} : memref<8x32xf32, #tpu.memory_space<vmem>>, vector<8x8xf32>,
    %43 = vector.extract_strided_slice %10 {offsets = [0, 8], sizes = [8, 8], strides = [1, 1]} : vector<8x32xf32> to vector<8x8xf32>
    %44 = arith.truncf %43 : vector<8x8xf32> to vector<8x8xbf16>
    %45 = vector.extract_strided_slice %16 {offsets = [0, 8], sizes = [8, 8], strides = [1, 1]} : vector<8x32xf32> to vector<8x8xf32>
    %46 = arith.truncf %45 : vector<8x8xf32> to vector<8x8xbf16>
    %47 = vector.extract_strided_slice %17 {offsets = [0, 8], sizes = [8, 8], strides = [1, 1]} : vector<8x32xf32> to vector<8x8xf32>
    %48 = arith.truncf %47 : vector<8x8xf32> to vector<8x8xbf16>
    %cst_24 = arith.constant dense<0.000000e+00> : vector<8x8xf32>
    %49 = tpu.matmul %44, %46, %cst_24 {dimension_numbers = #tpu.dot_dimension_numbers<[1], [1], [0], [0], [0, 0, 1, 0], [], []>} : vector<8x8xbf16>, vector<8x8xbf16>, vector<8x8xf32> -> vector<8x8xf32>
    %cst_25 = arith.constant 0.353553385 : f32
    %50 = vector.broadcast %cst_25 : f32 to vector<8x8xf32>
    %51 = arith.mulf %49, %50 : vector<8x8xf32>
    %52 = arith.addf %51, %19 : vector<8x8xf32>
    %cst_26 = arith.constant dense<0xFF800000> : vector<8xf32>
    %53 = vector.multi_reduction <maximumf>, %52, %cst_26 [1] : vector<8x8xf32> to vector<8xf32>
    %54 = vector.shape_cast %53 : vector<8xf32> to vector<8x1xf32>
    %55 = vector.broadcast %54 : vector<8x1xf32> to vector<8x8xf32>
    %56 = arith.subf %52, %55 : vector<8x8xf32>
    %57 = math.exp %56 : vector<8x8xf32>
    %cst_27 = arith.constant dense<0.000000e+00> : vector<8xf32>
    %58 = vector.multi_reduction <add>, %57, %cst_27 [1] : vector<8x8xf32> to vector<8xf32>
    %59 = vector.shape_cast %58 : vector<8xf32> to vector<8x1xf32>
    %60 = tpu.reciprocal %59 {approx = true} : vector<8x1xf32> -> vector<8x1xf32>
    %61 = vector.broadcast %60 : vector<8x1xf32> to vector<8x8xf32>
    %62 = arith.mulf %57, %61 : vector<8x8xf32>
    %63 = arith.truncf %62 : vector<8x8xf32> to vector<8x8xbf16>
    %cst_28 = arith.constant dense<0.000000e+00> : vector<8x8xf32>
    %64 = tpu.matmul %63, %48, %cst_28 {dimension_numbers = #tpu.dot_dimension_numbers<[1], [0], [0], [1], [0, 0, 1, 1], [], []>} : vector<8x8xbf16>, vector<8x8xbf16>, vector<8x8xf32> -> vector<8x8xf32>
    %c0_29 = arith.constant 0 : index
    %c8 = arith.constant 8 : index
    %65 = vector.load %arg13[%c0_29, %c8] : memref<8x32xf32, #tpu.memory_space<vmem>>, vector<8x8xf32>
    tpu.vector_store %arg13[%c0_29, %c8], %64 {strides = array<i32>} : memref<8x32xf32, #tpu.memory_space<vmem>>, vector<8x8xf32>,
    %66 = vector.extract_strided_slice %10 {offsets = [0, 16], sizes = [8, 8], strides = [1, 1]} : vector<8x32xf32> to vector<8x8xf32>
    %67 = arith.truncf %66 : vector<8x8xf32> to vector<8x8xbf16>
    %68 = vector.extract_strided_slice %16 {offsets = [0, 16], sizes = [8, 8], strides = [1, 1]} : vector<8x32xf32> to vector<8x8xf32>
    %69 = arith.truncf %68 : vector<8x8xf32> to vector<8x8xbf16>
    %70 = vector.extract_strided_slice %17 {offsets = [0, 16], sizes = [8, 8], strides = [1, 1]} : vector<8x32xf32> to vector<8x8xf32>
    %71 = arith.truncf %70 : vector<8x8xf32> to vector<8x8xbf16>
    %cst_30 = arith.constant dense<0.000000e+00> : vector<8x8xf32>
    %72 = tpu.matmul %67, %69, %cst_30 {dimension_numbers = #tpu.dot_dimension_numbers<[1], [1], [0], [0], [0, 0, 1, 0], [], []>} : vector<8x8xbf16>, vector<8x8xbf16>, vector<8x8xf32> -> vector<8x8xf32>
    %cst_31 = arith.constant 0.353553385 : f32
    %73 = vector.broadcast %cst_31 : f32 to vector<8x8xf32>
    %74 = arith.mulf %72, %73 : vector<8x8xf32>
    %75 = arith.addf %74, %19 : vector<8x8xf32>
    %cst_32 = arith.constant dense<0xFF800000> : vector<8xf32>
    %76 = vector.multi_reduction <maximumf>, %75, %cst_32 [1] : vector<8x8xf32> to vector<8xf32>
    %77 = vector.shape_cast %76 : vector<8xf32> to vector<8x1xf32>
    %78 = vector.broadcast %77 : vector<8x1xf32> to vector<8x8xf32>
    %79 = arith.subf %75, %78 : vector<8x8xf32>
    %80 = math.exp %79 : vector<8x8xf32>
    %cst_33 = arith.constant dense<0.000000e+00> : vector<8xf32>
    %81 = vector.multi_reduction <add>, %80, %cst_33 [1] : vector<8x8xf32> to vector<8xf32>
    %82 = vector.shape_cast %81 : vector<8xf32> to vector<8x1xf32>
    %83 = tpu.reciprocal %82 {approx = true} : vector<8x1xf32> -> vector<8x1xf32>
    %84 = vector.broadcast %83 : vector<8x1xf32> to vector<8x8xf32>
    %85 = arith.mulf %80, %84 : vector<8x8xf32>
    %86 = arith.truncf %85 : vector<8x8xf32> to vector<8x8xbf16>
    %cst_34 = arith.constant dense<0.000000e+00> : vector<8x8xf32>
    %87 = tpu.matmul %86, %71, %cst_34 {dimension_numbers = #tpu.dot_dimension_numbers<[1], [0], [0], [1], [0, 0, 1, 1], [], []>} : vector<8x8xbf16>, vector<8x8xbf16>, vector<8x8xf32> -> vector<8x8xf32>
    %c0_35 = arith.constant 0 : index
    %c16 = arith.constant 16 : index
    %88 = vector.load %arg13[%c0_35, %c16] : memref<8x32xf32, #tpu.memory_space<vmem>>, vector<8x8xf32>
    tpu.vector_store %arg13[%c0_35, %c16], %87 {strides = array<i32>} : memref<8x32xf32, #tpu.memory_space<vmem>>, vector<8x8xf32>,
    %89 = vector.extract_strided_slice %10 {offsets = [0, 24], sizes = [8, 8], strides = [1, 1]} : vector<8x32xf32> to vector<8x8xf32>
    %90 = arith.truncf %89 : vector<8x8xf32> to vector<8x8xbf16>
    %91 = vector.extract_strided_slice %16 {offsets = [0, 24], sizes = [8, 8], strides = [1, 1]} : vector<8x32xf32> to vector<8x8xf32>
    %92 = arith.truncf %91 : vector<8x8xf32> to vector<8x8xbf16>
    %93 = vector.extract_strided_slice %17 {offsets = [0, 24], sizes = [8, 8], strides = [1, 1]} : vector<8x32xf32> to vector<8x8xf32>
    %94 = arith.truncf %93 : vector<8x8xf32> to vector<8x8xbf16>
    %cst_36 = arith.constant dense<0.000000e+00> : vector<8x8xf32>
    %95 = tpu.matmul %90, %92, %cst_36 {dimension_numbers = #tpu.dot_dimension_numbers<[1], [1], [0], [0], [0, 0, 1, 0], [], []>} : vector<8x8xbf16>, vector<8x8xbf16>, vector<8x8xf32> -> vector<8x8xf32>
    %cst_37 = arith.constant 0.353553385 : f32
    %96 = vector.broadcast %cst_37 : f32 to vector<8x8xf32>
    %97 = arith.mulf %95, %96 : vector<8x8xf32>
    %98 = arith.addf %97, %19 : vector<8x8xf32>
    %cst_38 = arith.constant dense<0xFF800000> : vector<8xf32>
    %99 = vector.multi_reduction <maximumf>, %98, %cst_38 [1] : vector<8x8xf32> to vector<8xf32>
    %100 = vector.shape_cast %99 : vector<8xf32> to vector<8x1xf32>
    %101 = vector.broadcast %100 : vector<8x1xf32> to vector<8x8xf32>
    %102 = arith.subf %98, %101 : vector<8x8xf32>
    %103 = math.exp %102 : vector<8x8xf32>
    %cst_39 = arith.constant dense<0.000000e+00> : vector<8xf32>
    %104 = vector.multi_reduction <add>, %103, %cst_39 [1] : vector<8x8xf32> to vector<8xf32>
    %105 = vector.shape_cast %104 : vector<8xf32> to vector<8x1xf32>
    %106 = tpu.reciprocal %105 {approx = true} : vector<8x1xf32> -> vector<8x1xf32>
    %107 = vector.broadcast %106 : vector<8x1xf32> to vector<8x8xf32>
    %108 = arith.mulf %103, %107 : vector<8x8xf32>
    %109 = arith.truncf %108 : vector<8x8xf32> to vector<8x8xbf16>
    %cst_40 = arith.constant dense<0.000000e+00> : vector<8x8xf32>
    %110 = tpu.matmul %109, %94, %cst_40 {dimension_numbers = #tpu.dot_dimension_numbers<[1], [0], [0], [1], [0, 0, 1, 1], [], []>} : vector<8x8xbf16>, vector<8x8xbf16>, vector<8x8xf32> -> vector<8x8xf32>
    %c0_41 = arith.constant 0 : index
    %c24 = arith.constant 24 : index
    %111 = vector.load %arg13[%c0_41, %c24] : memref<8x32xf32, #tpu.memory_space<vmem>>, vector<8x8xf32>
    tpu.vector_store %arg13[%c0_41, %c24], %110 {strides = array<i32>} : memref<8x32xf32, #tpu.memory_space<vmem>>, vector<8x8xf32>,
    %c0_42 = arith.constant 0 : index
    %c0_43 = arith.constant 0 : index
    %112 = vector.load %arg13[%c0_42, %c0_43] : memref<8x32xf32, #tpu.memory_space<vmem>>, vector<8x32xf32>
    %113 = arith.truncf %112 : vector<8x32xf32> to vector<8x32xbf16>
    %c0_44 = arith.constant 0 : index
    %c0_45 = arith.constant 0 : index
    %114 = vector.load %arg8[%c0_44, %c0_45] : memref<32x32xbf16, #tpu.memory_space<vmem>>, vector<32x32xbf16>
    %cst_46 = arith.constant dense<0.000000e+00> : vector<8x32xf32>
    %115 = tpu.matmul %113, %114, %cst_46 {dimension_numbers = #tpu.dot_dimension_numbers<[1], [0], [0], [1], [0, 0, 1, 1], [], []>} : vector<8x32xbf16>, vector<32x32xbf16>, vector<8x32xf32> -> vector<8x32xf32>
    %c0_47 = arith.constant 0 : index
    %c0_48 = arith.constant 0 : index
    %116 = vector.load %arg9[%c0_47, %c0_48] : memref<1x32xf32, #tpu.memory_space<vmem>>, vector<1x32xf32>
    %117 = vector.broadcast %116 : vector<1x32xf32> to vector<8x32xf32>
    %118 = arith.addf %115, %117 : vector<8x32xf32>
    %119 = arith.addf %118, %1 : vector<8x32xf32>
    %cst_49 = arith.constant dense<0.000000e+00> : vector<8xf32>
    %120 = vector.multi_reduction <add>, %119, %cst_49 [1] : vector<8x32xf32> to vector<8xf32>
    %121 = vector.shape_cast %120 : vector<8xf32> to vector<8x1xf32>
    %cst_50 = arith.constant 3.200000e+01 : f32
    %122 = vector.broadcast %cst_50 : f32 to vector<8x1xf32>
    %123 = arith.divf %121, %122 : vector<8x1xf32>
    %124 = vector.broadcast %123 : vector<8x1xf32> to vector<8x32xf32>
    %125 = arith.subf %119, %124 : vector<8x32xf32>
    %126 = arith.mulf %125, %125 : vector<8x32xf32>
    %cst_51 = arith.constant dense<0.000000e+00> : vector<8xf32>
    %127 = vector.multi_reduction <add>, %126, %cst_51 [1] : vector<8x32xf32> to vector<8xf32>
    %128 = vector.shape_cast %127 : vector<8xf32> to vector<8x1xf32>
    %cst_52 = arith.constant 3.200000e+01 : f32
    %129 = vector.broadcast %cst_52 : f32 to vector<8x1xf32>
    %130 = arith.divf %128, %129 : vector<8x1xf32>
    %131 = vector.broadcast %123 : vector<8x1xf32> to vector<8x32xf32>
    %132 = arith.subf %119, %131 : vector<8x32xf32>
    %cst_53 = arith.constant 9.99999974E-6 : f32
    %133 = vector.broadcast %cst_53 : f32 to vector<8x1xf32>
    %134 = arith.addf %130, %133 : vector<8x1xf32>
    %135 = math.rsqrt %134 : vector<8x1xf32>
    %136 = vector.broadcast %135 : vector<8x1xf32> to vector<8x32xf32>
    %137 = arith.mulf %132, %136 : vector<8x32xf32>
    %c0_54 = arith.constant 0 : index
    %c0_55 = arith.constant 0 : index
    %138 = vector.load %arg10[%c0_54, %c0_55] : memref<1x32xf32, #tpu.memory_space<vmem>>, vector<1x32xf32>
    %139 = vector.broadcast %138 : vector<1x32xf32> to vector<8x32xf32>
    %140 = arith.mulf %137, %139 : vector<8x32xf32>
    %c0_56 = arith.constant 0 : index
    %c0_57 = arith.constant 0 : index
    %141 = vector.load %arg11[%c0_56, %c0_57] : memref<1x32xf32, #tpu.memory_space<vmem>>, vector<1x32xf32>
    %142 = vector.broadcast %141 : vector<1x32xf32> to vector<8x32xf32>
    %143 = arith.addf %140, %142 : vector<8x32xf32>
    %c0_58 = arith.constant 0 : index
    %c0_59 = arith.constant 0 : index
    %c0_60 = arith.constant 0 : index
    %144 = vector.load %arg12[%c0_58, %c0_59, %c0_60] : memref<1x8x32xf32, #tpu.memory_space<vmem>>, vector<1x8x32xf32>
    %145 = vector.shape_cast %144 : vector<1x8x32xf32> to vector<8x32xf32>
    %146 = vector.shape_cast %143 : vector<8x32xf32> to vector<1x8x32xf32>
    tpu.vector_store %arg12[%c0_58, %c0_59, %c0_60], %146 {strides = array<i32>} : memref<1x8x32xf32, #tpu.memory_space<vmem>>, vector<1x8x32xf32>,
    return
  }
  func.func @transform_0(%arg0: i32) -> (i32, i32, i32) {
    %c0_i32 = arith.constant 0 : i32
    %c0_i32_0 = arith.constant 0 : i32
    %c0_i32_1 = arith.constant 0 : i32
    return %arg0, %c0_i32, %c0_i32_0 : i32, i32, i32
  }
  func.func @transform_1(%arg0: i32) -> (i32, i32, i32) {
    %c0_i32 = arith.constant 0 : i32
    %c0_i32_0 = arith.constant 0 : i32
    %c0_i32_1 = arith.constant 0 : i32
    return %arg0, %c0_i32, %c0_i32_0 : i32, i32, i32
  }
  func.func @transform_2(%arg0: i32) -> (i32, i32) {
    %c0_i32 = arith.constant 0 : i32
    %c0_i32_0 = arith.constant 0 : i32
    %c0_i32_1 = arith.constant 0 : i32
    return %c0_i32, %c0_i32_0 : i32, i32
  }
  func.func @transform_3(%arg0: i32) -> (i32, i32) {
    %c0_i32 = arith.constant 0 : i32
    %c0_i32_0 = arith.constant 0 : i32
    %c0_i32_1 = arith.constant 0 : i32
    return %c0_i32, %c0_i32_0 : i32, i32
  }
  func.func @transform_4(%arg0: i32) -> (i32, i32) {
    %c0_i32 = arith.constant 0 : i32
    %c0_i32_0 = arith.constant 0 : i32
    %c0_i32_1 = arith.constant 0 : i32
    return %c0_i32, %c0_i32_0 : i32, i32
  }
  func.func @transform_5(%arg0: i32) -> (i32, i32) {
    %c0_i32 = arith.constant 0 : i32
    %c0_i32_0 = arith.constant 0 : i32
    %c0_i32_1 = arith.constant 0 : i32
    return %c0_i32, %c0_i32_0 : i32, i32
  }
  func.func @transform_6(%arg0: i32) -> (i32, i32, i32) {
    %c0_i32 = arith.constant 0 : i32
    %c0_i32_0 = arith.constant 0 : i32
    %c0_i32_1 = arith.constant 0 : i32
    return %arg0, %c0_i32, %c0_i32_0 : i32, i32, i32
  }
  func.func @transform_7(%arg0: i32) -> (i32, i32) {
    %c0_i32 = arith.constant 0 : i32
    %c0_i32_0 = arith.constant 0 : i32
    %c0_i32_1 = arith.constant 0 : i32
    return %c0_i32, %c0_i32_0 : i32, i32
  }
  func.func @transform_8(%arg0: i32) -> (i32, i32) {
    %c0_i32 = arith.constant 0 : i32
    %c0_i32_0 = arith.constant 0 : i32
    %c0_i32_1 = arith.constant 0 : i32
    return %c0_i32, %c0_i32_0 : i32, i32
  }
  func.func @transform_9(%arg0: i32) -> (i32, i32) {
    %c0_i32 = arith.constant 0 : i32
    %c0_i32_0 = arith.constant 0 : i32
    %c0_i32_1 = arith.constant 0 : i32
    return %c0_i32, %c0_i32_0 : i32, i32
  }
  func.func @transform_10(%arg0: i32) -> (i32, i32) {
    %c0_i32 = arith.constant 0 : i32
    %c0_i32_0 = arith.constant 0 : i32
    %c0_i32_1 = arith.constant 0 : i32
    return %c0_i32, %c0_i32_0 : i32, i32
  }
  func.func @transform_11(%arg0: i32) -> (i32, i32, i32) {
    %c0_i32 = arith.constant 0 : i32
    %c0_i32_0 = arith.constant 0 : i32
    %c0_i32_1 = arith.constant 0 : i32
    return %arg0, %c0_i32, %c0_i32_0 : i32, i32, i32
  }
}

</mosaic_0001>

<bundles_post_ra>
// kernel: decoder_forward.13
= control target key start
LH: loop header
LB: loop body
LE: loop exit
PB: predicated region body
PF: predicated region fallthrough
CT: control target
= control target key end

     0   :  { %s160_s0 = inlined_call_operand.vmem [shape: f32[16,32], index: 0, kind: input, shape index: {}]   ;;  %s161_s1 = inlined_call_operand.vmem [shape: bf16[32,50], index: 1, kind: input, shape index: {}]   ;;  %s162_s2 = inlined_call_operand.vmem [shape: f32[1,50], index: 2, kind: input, shape index: {}]   ;;  %s163_s3 = inlined_call_operand.hbm [shape: f32[16,50], index: 3, kind: output, shape index: {}]  }
   0x1   :  { %v88_v0 = vld [vmem:[%s161_s1 + $0x8] sm:$0xff]  ;;  %v87_v1 = vld [vmem:[%s161_s1] sm:$0xff] }
   0x2   :  { %49 = vmatpush.bf16.msra.mxu0 %v88_v0  ;;  %v16_v2 = vld [vmem:[%s160_s0] sm:$0xff]  ;;  %v17_v3 = vld [vmem:[%s160_s0 + $0x8] sm:$0xff] }
   0x3   :  { %8 = vsyncpa [#allocation3], 0  ;;  %v18_v4 = vpack.c.bf16 %v17_v3, %v16_v2  ;;  %vm39_vm0 = vcmask 261120   ;;  %v92_v5 = vld [vmem:[%s162_s2] ss:$0 sm:$0xff]  ;;  %vm57_vm1 = vcmask 408576  }
   0x4   :  { %s119_s1 = smov [#allocation2]   ;;  %s66_s25 = sshll.u32 %s163_s3, 4  ;;  %s67_s25 = int_to_ptr.hbm [resolvable:$true] %s66_s25 }
   0x5   :  { %s64_s22 = sshll.u32 %s119_s1, 4  ;;  %s120_s0 = smov 128   ;;  %s65_s22 = int_to_ptr.vmem [resolvable:$true] %s64_s22 }
   0x6   :  { %50 = vmatpush.bf16.msra.mxu0 %v87_v1  ;;  %s121_s26 = smov 8  }
   0x9   :  { %86 = vmatmul.msk.bf16.vlgmr.msra.gmra.mxu0 %vm39_vm0, %v18_v4 }
  0x86   :  { %v52_v6 = vpop.f32.mrf.mxu0 }
  0x87   :  { %v53_v7 = vadd.f32 %v92_v5, %v52_v6 }
  0x89   :  { %58 = vst.msk [vmem:[#allocation2] sm:$0xff] %vm57_vm1, %v53_v7 }
  0x8e   :  { %v54_v8 = vpop.f32.mrf.mxu0 }
  0x8f   :  { %v55_v9 = vadd.f32 %v92_v5, %v54_v8 }
  0x91   :  { %59 = vst.msk [vmem:[#allocation2 + $0x8] sm:$0xff] %vm57_vm1, %v55_v9 }
  0x92   :  { %72 = dma.vmem_to_hbm [thread:$0]  %s65_s22, 256, %s67_s25, [#allocation3], %s120_s0, %s120_s0, %s121_s26  }
  0x93   :  { %117 = dma.done.wait [#allocation3], 256  }
  0x94   :  { %118 = vsyncadd [#allocation3], 4294967040 }
  0x95   :  { %77 = vsyncpa [#allocation3], 1 }

// kernel: decoder_forward.9
= control target key start
LH: loop header
LB: loop body
LE: loop exit
PB: predicated region body
PF: predicated region fallthrough
CT: control target
= control target key end

     0   :  { %vm50_vm0 = vcmask 261120   ;;  %vm107_vm1 = vcmask 523264   ;;  %v239_v26 = vmov 32.0   ;;  %s329_s1 = inlined_call_operand.vmem [shape: bf16[32,64], index: 1, kind: input, shape index: {}]   ;;  %s330_s0 = inlined_call_operand.vmem [shape: f32[16,32], index: 0, kind: input, shape index: {}]   ;;  %s331_s2 = inlined_call_operand.vmem [shape: f32[1,64], index: 2, kind: input, shape index: {}]   ;;  %s332_s4 = inlined_call_operand.vmem [shape: f32[1,32], index: 4, kind: input, shape index: {}]   ;;  %s333_s3 = inlined_call_operand.vmem [shape: bf16[64,32], index: 3, kind: input, shape index: {}]   ;;  %s334_s5 = inlined_call_operand.vmem [shape: f32[1,32], index: 5, kind: input, shape index: {}]   ;;  %s335_s6 = inlined_call_operand.vmem [shape: f32[1,32], index: 6, kind: input, shape index: {}]   ;;  %s336_s7 = inlined_call_operand.vmem [shape: f32[16,32], index: 7, kind: output, shape index: {}]  }
   0x1   :  { %v223_v0 = vld [vmem:[%s329_s1 + $0x8] sm:$0xff]  ;;  %v222_v1 = vld [vmem:[%s329_s1] sm:$0xff]  ;;  %v227_v5 = vld [vmem:[%s333_s3 + $0x18] sm:$0xff]  ;;  %233 = vrcp.f32 %v239_v26 }
   0x2   :  { %60 = vmatpush.bf16.msra.mxu0 %v223_v0  ;;  %v27_v2 = vld [vmem:[%s330_s0] sm:$0xff]  ;;  %v28_v3 = vld [vmem:[%s330_s0 + $0x8] sm:$0xff]  ;;  %115 = vmatpush.bf16.msra.mxu1 %v227_v5  ;;  %v226_v6 = vld [vmem:[%s333_s3 + $0x10] sm:$0xff] }
   0x3   :  { %v29_v4 = vpack.c.bf16 %v28_v3, %v27_v2  ;;  %v225_v7 = vld [vmem:[%s333_s3 + $0x8] sm:$0xff]  ;;  %v224_v8 = vld [vmem:[%s333_s3] sm:$0xff] }
   0x4   :  { %v229_v10 = vld [vmem:[%s331_s2] ss:$0 sm:$0xff] }
   0x5   :  { %v230_v17 = vld [vmem:[%s332_s4] ss:$0 sm:$0xff] }
   0x6   :  { %61 = vmatpush.bf16.msra.mxu0 %v222_v1  ;;  %116 = vmatpush.bf16.msra.mxu1 %v226_v6  ;;  %v231_v57 = vld [vmem:[%s334_s5] ss:$0 sm:$0xff] }
   0x7   :  { %v234_v27 = vpop.eup %233  ;;  %v232_v60 = vld [vmem:[%s335_s6] ss:$0 sm:$0xff] }
   0x8   :  { %v134_v28 = vmul.f32 32.0, %v234_v27  ;;  %vm138_vm2 = vweird.f32 %v234_v27 }
   0x9   :  { %204 = vmatmul.msk.bf16.vlgmr.msra.gmra.mxu0 %vm50_vm0, %v29_v4 }
   0xa   :  { %117 = vmatpush.bf16.msra.mxu1 %v225_v7  ;;  %v135_v29 = vsub.f32 1.0, %v134_v28 }
   0xc   :  { %v136_v30 = vmul.f32 %v234_v27, %v135_v29 }
   0xe   :  { %118 = vmatpush.bf16.msra.mxu1 %v224_v8  ;;  %v137_v31 = vadd.f32 %v234_v27, %v136_v30 }
  0x10   :  { %v139_v32 = vsel %vm138_vm2, %v234_v27, %v137_v31 }
  0x86   :  { %v63_v9 = vpop.f32.mrf.mxu0 }
  0x87   :  { %v64_v11 = vadd.f32 %v229_v10, %v63_v9 }
  0x89   :  { %v68_v14 = vmax.f32 %v64_v11, 0.0 }
  0x8e   :  { %v65_v12 = vpop.f32.mrf.mxu0 }
  0x8f   :  { %v66_v13 = vadd.f32 %v229_v10, %v65_v12 }
  0x91   :  { %v69_v15 = vmax.f32 %v66_v13, 0.0 }
  0x93   :  { %v70_v16 = vpack.c.bf16 %v69_v15, %v68_v14 }
  0x95   :  { %221 = vmatmul.msk.bf16.vlgmr.msra.gmra.mxu1 %vm107_vm1, %v70_v16 }
 0x112   :  { %v120_v18 = vpop.f32.mrf.mxu1 }
 0x113   :  { %v121_v19 = vadd.f32 %v230_v17, %v120_v18 }
 0x115   :  { %v125_v20 = vadd.f32 %v121_v19, %v27_v2 }
 0x117   :  { %v127_v21 = vsel %vm50_vm0, %v125_v20, 0.0 }
 0x118   :  { %128 = vadd.xlane.f32.xlu0 %v127_v21 }
 0x11a   :  { %v122_v22 = vpop.f32.mrf.mxu1 }
 0x11b   :  { %v123_v23 = vadd.f32 %v230_v17, %v122_v22 }
 0x11d   :  { %v126_v24 = vadd.f32 %v123_v23, %v28_v3 }
 0x11f   :  { %v130_v25 = vsel %vm50_vm0, %v126_v24, 0.0 }
 0x120   :  { %131 = vadd.xlane.f32.xlu0 %v130_v25 }
 0x18b   :  { %v129_v33 = vpop.xlane.xlu0 %128 }
 0x18c   :  { %v140_v34 = vmul.f32 %v139_v32, %v129_v33 }
 0x18e   :  { %v142_v35 = vsub.f32 %v125_v20, %v140_v34 }
 0x190   :  { %v144_v36 = vmul.f32 %v142_v35, %v142_v35 }
 0x192   :  { %v146_v37 = vsel %vm50_vm0, %v144_v36, 0.0 }
 0x193   :  { %147 = vadd.xlane.f32.xlu1 %v146_v37  ;;  %v132_v38 = vpop.xlane.xlu0 %131 }
 0x194   :  { %v141_v39 = vmul.f32 %v139_v32, %v132_v38 }
 0x196   :  { %v143_v40 = vsub.f32 %v126_v24, %v141_v39 }
 0x198   :  { %v145_v41 = vmul.f32 %v143_v40, %v143_v40 }
 0x19a   :  { %v149_v42 = vsel %vm50_vm0, %v145_v41, 0.0 }
 0x19b   :  { %150 = vadd.xlane.f32.xlu1 %v149_v42 }
 0x206   :  { %v148_v43 = vpop.xlane.xlu1 %147 }
 0x207   :  { %v152_v44 = vmul.f32 %v148_v43, %v139_v32 }
 0x209   :  { %v154_v45 = vadd.f32 1e-05, %v152_v44 }
 0x20b   :  { %235 = vrsqrt.f32 %v154_v45  ;;  %vm162_vm4 = vweird.f32 %v154_v45 }
 0x20e   :  { %v151_v46 = vpop.xlane.xlu1 %150 }
 0x20f   :  { %v153_v47 = vmul.f32 %v151_v46, %v139_v32 }
 0x211   :  { %v236_v48 = vpop.eup %235  ;;  %v155_v49 = vadd.f32 1e-05, %v153_v47 }
 0x212   :  { %v157_v50 = vmul.f32 %v236_v48, %v154_v45  ;;  %vm163_vm3 = vweird.f32 %v236_v48 }
 0x213   :  { %237 = vrsqrt.f32 %v155_v49  ;;  %vm164_vm5 = vmor %vm162_vm4, %vm163_vm3  ;;  %vm172_vm7 = vweird.f32 %v155_v49 }
 0x214   :  { %v158_v51 = vmul.f32 %v236_v48, %v157_v50 }
 0x216   :  { %v159_v52 = vmul.f32 0.5, %v158_v51 }
 0x218   :  { %v160_v53 = vsub.f32 1.5, %v159_v52 }
 0x219   :  { %v238_v54 = vpop.eup %237 }
 0x21a   :  { %v161_v55 = vmul.f32 %v236_v48, %v160_v53  ;;  %v167_v56 = vmul.f32 %v238_v54, %v155_v49  ;;  %vm173_vm6 = vweird.f32 %v238_v54 }
 0x21b   :  { %vm174_vm8 = vmor %vm172_vm7, %vm173_vm6 }
 0x21c   :  { %v165_v58 = vsel %vm164_vm5, %v236_v48, %v161_v55  ;;  %v168_v59 = vmul.f32 %v238_v54, %v167_v56 }
 0x21d   :  { %v176_v61 = vmul.f32 %v165_v58, %v142_v35 }
 0x21e   :  { %v169_v62 = vmul.f32 0.5, %v168_v59 }
 0x21f   :  { %v182_v63 = vmul.f32 %v231_v57, %v176_v61 }
 0x220   :  { %v170_v0 = vsub.f32 1.5, %v169_v62 }
 0x221   :  { %v188_v1 = vadd.f32 %v232_v60, %v182_v63 }
 0x222   :  { %v171_v2 = vmul.f32 %v238_v54, %v170_v0 }
 0x223   :  { %190 = vst.msk [vmem:[%s336_s7] sm:$0xff] %vm50_vm0, %v188_v1 }
 0x224   :  { %v175_v3 = vsel %vm174_vm8, %v238_v54, %v171_v2 }
 0x225   :  { %v177_v4 = vmul.f32 %v175_v3, %v143_v40 }
 0x227   :  { %v183_v5 = vmul.f32 %v231_v57, %v177_v4 }
 0x229   :  { %v189_v6 = vadd.f32 %v232_v60, %v183_v5 }
 0x22b   :  { %191 = vst.msk [vmem:[%s336_s7 + $0x8] sm:$0xff] %vm50_vm0, %v189_v6 }

// kernel: decoder_forward.7
= control target key start
LH: loop header
LB: loop body
LE: loop exit
PB: predicated region body
PF: predicated region fallthrough
CT: control target
= control target key end

     0   :  { %s1079_s17 = smov 0   ;;  %s1189_s0 = inlined_call_operand.vmem [shape: f32[2,8,32], index: 0, kind: input, shape index: {}, may-alias: {0,1}]   ;;  %s1190_s1 = inlined_call_operand.vmem [shape: f32[2,8,32], index: 1, kind: input, shape index: {}, may-alias: {0,1}]   ;;  %s1191_s2 = inlined_call_operand.vmem [shape: bf16[32,32], index: 2, kind: input, shape index: {}]   ;;  %s1192_s3 = inlined_call_operand.vmem [shape: f32[1,32], index: 3, kind: input, shape index: {}]   ;;  %s1193_s4 = inlined_call_operand.vmem [shape: bf16[32,64], index: 4, kind: input, shape index: {}]   ;;  %s1194_s5 = inlined_call_operand.vmem [shape: f32[1,64], index: 5, kind: input, shape index: {}]   ;;  %s1195_s6 = inlined_call_operand.vmem [shape: f32[2,8,8], index: 6, kind: input, shape index: {}]   ;;  %s1196_s7 = inlined_call_operand.vmem [shape: bf16[32,32], index: 7, kind: input, shape index: {}]   ;;  %s1197_s8 = inlined_call_operand.vmem [shape: f32[1,32], index: 8, kind: input, shape index: {}]   ;;  %s1198_s9 = inlined_call_operand.vmem [shape: f32[1,32], index: 9, kind: input, shape index: {}]   ;;  %s1199_s10 = inlined_call_operand.vmem [shape: f32[1,32], index: 10, kind: input, shape index: {}]   ;;  %s1200_s11 = inlined_call_operand.vmem [shape: f32[2,8,32], index: 11, kind: output, shape index: {}]  }
   0x1 LB: > { %s904_s18 = sadd.s32 4294967295, %s1006_s17   ;;  %p908_p0 = scmp.ge.s32.totalorder %s1006_s17, 1  ;;  %s1006_s17 = sphi %s1079_s17, %s21_s17  }
   0x2   : > { %p354_p1 = scmp.lt.s32.totalorder %s1006_s17, 3 }
   0x4   : > { %p355_p2 = pnand %p908_p0, %p354_p1 }
   0x5   : > { %p400_p3 = scmp.lt.s32.totalorder (!%p355_p2), %s904_s18, 1  ;;  %s1008_s20 = smov (!%p355_p2), 120  }
   0x6   : > { %358 = sbr.rel (%p355_p2) target bundleno = 1617 (0x651), region = 64  ;;  %s1009_s21 = smov (!%p355_p2), 96  }
   0x7   : > { %s1010_s22 = smov (!%p355_p2), 112   ;;  %s1011_s23 = smov (!%p355_p2), 104  }
   0x8   : > { %s1012_s28 = smov (!%p355_p2), 88   ;;  %s1013_s29 = smov (!%p355_p2), 80  }
   0x9   : > { %s1015_s12 = smov (!%p355_p2), 8   ;;  %s1016_s13 = smov (!%p355_p2), 16  }
   0xb   : > { %v951_v0 = vld [vmem:[%s1191_s2 + $0x8] sm:$0xff]  ;;  %v950_v2 = vld [vmem:[%s1191_s2] sm:$0xff]  ;;  %s1202_s18 = smov (!%p400_p3, %s904_s18), 1  ;;  %vm441_vm0 = vcmask 261120   ;;  %vm497_vm1 = vcmask 64512   ;;  %vm537_vm2 = vcmask 1043456  }
   0xc   : > { %v953_v1 = vld [vmem:[%s1193_s4 + $0x8] sm:$0xff]  ;;  %451 = vmatpush.bf16.msra.mxu0 %v951_v0  ;;  %v952_v3 = vld [vmem:[%s1193_s4] sm:$0xff]  ;;  %s1099_s27 = sshll.u32 %s1202_s18, 3  ;;  %vm618_vm3 = vcmask 130112   ;;  %vm682_vm4 = vcmask 195712   ;;  %vm746_vm5 = vcmask 261312  }
   0xd   : > { %487 = vmatpush.bf16.msra.mxu1 %v953_v1  ;;  %s403_s30 = scalar_lea.vmem %s1189_s0, %s1099_s27  ;;  %s407_s14 = scalar_lea.vmem %s1190_s1, %s1099_s27  ;;  %v975_v8 = vld [vmem:[%s1192_s3] ss:$0 sm:$0xff] }
   0xe   : > { %v1105_v4 = vld [vmem:[%s403_s30] sm:$0xff]  ;;  %s411_s26 = scalar_lea.vmem %s1195_s6, %s1099_s27  ;;  %s1014_s30 = smov 72  }
   0xf   : > { %v419_v5 = vpack.c.bf16 %v1105_v4, %v1105_v4  ;;  %v418_v6 = vld [vmem:[%s407_s14] sm:$0xff]  ;;  %s1017_s14 = smov 24  }
  0x10   : > { %452 = vmatpush.bf16.msra.mxu0 %v950_v2  ;;  %v420_v7 = vpack.c.bf16 %v418_v6, %v418_v6  ;;  %v976_v9 = vld [vmem:[%s1194_s5] ss:$0 sm:$0xff] }
  0x11   : > { %488 = vmatpush.bf16.msra.mxu1 %v952_v3  ;;  %v494_v28 = vld [vmem:[%s411_s26] sm:$0xff] }
  0x13   : > { %921 = vmatmul.msk.bf16.vlgmr.msra.gmra.mxu0 %vm441_vm0, %v419_v5 }
  0x14   : > { %930 = vmatmul.msk.bf16.vlgmr.msra.gmra.mxu1 %vm441_vm0, %v420_v7 }
  0x90   : > { %v454_v10 = vpop.f32.mrf.mxu0 }
  0x91   : > { %v455_v11 = vadd.f32 %v975_v8, %v454_v10  ;;  %v490_v12 = vpop.f32.mrf.mxu1 }
  0x92   : > { %v491_v13 = vadd.f32 %v976_v9, %v490_v12 }
  0x93   : > { %v495_v14 = vpack.c.bf16 %v455_v11, %v455_v11 }
  0x94   : > { %v1121_v15 = vpack.c.bf16 %v491_v13, %v491_v13 }
  0x95   : > { %556 = vrot.lane.b32.xlu2 %v495_v14, %s1008_s20 }
  0x96   : > { %532 = vrot.lane.b32.xlu1 %v1121_v15, %s1009_s21  ;;  %v502_v16 = vsel %vm497_vm1, %v1121_v15, 0 }
  0x97   : > { %511 = vmatpush.bf16.xpose.msra.mxu2 %v502_v16 }
  0x98   : > { %v456_v17 = vpop.f32.mrf.mxu0 }
  0x99   : > { %v492_v18 = vpop.f32.mrf.mxu1 }
  0x9d   : > { %622 = vrot.lane.b32.xlu2 %v1121_v15, %s1010_s22 }
  0x9e   : > { %558 = vrot.lane.b32.xlu1 %v1121_v15, %s1008_s20  ;;  %931 = vmatmul.msk.bf16.vlgmr.msra.gmra.mxu2 %vm497_vm1, %v495_v14 }
  0xa5   : > { %684 = vrot.lane.b32.xlu2 %v495_v14, %s1011_s23 }
  0xa6   : > { %620 = vrot.lane.b32.xlu1 %v495_v14, %s1010_s22 }
  0xef   : > { %v557_v19 = vpop.permute.xlu2 %556 }
  0xf7   : > { %v623_v20 = vpop.permute.xlu2 %622 }
  0xf8   : > { %v628_v21 = vsel %vm497_vm1, %v623_v20, 0 }
  0xf9   : > { %637 = vmatpush.bf16.xpose.msrb.mxu1 %v628_v21 }
  0xff   : > { %v685_v43 = vpop.permute.xlu2 %684 }
 0x108   : > { %v533_v22 = vpop.permute.xlu1 %532 }
 0x109   : > { %v539_v23 = vsel %vm537_vm2, %v533_v22, 0 }
 0x10a   : > { %548 = vmatpush.bf16.msra.mxu3 %v539_v23 }
 0x110   : > { %v559_v24 = vpop.permute.xlu1 %558 }
 0x111   : > { %v564_v25 = vsel %vm497_vm1, %v559_v24, 0 }
 0x112   : > { %573 = vmatpush.bf16.xpose.msrb.mxu3 %v564_v25 }
 0x118   : > { %v621_v26 = vpop.permute.xlu1 %620 }
 0x119   : > { %935 = vmatmul.msk.bf16.vlgmr.msrb.gmra.mxu1 %vm497_vm1, %v621_v26 }
 0x121   : > { %v513_v27 = vpop.f32.mrf.mxu2 }
 0x122   : > { %v517_v29 = vmul.f32 0.35355338, %v513_v27 }
 0x124   : > { %v518_v30 = vadd.f32 %v517_v29, %v494_v28 }
 0x126   : > { %v519_v31 = vsel %vm497_vm1, %v518_v30, -inf }
 0x127   : > { %520 = vmax.xlane.f32.xlu0 %v519_v31 }
 0x129   : > { %v515_v32 = vpop.f32.mrf.mxu2 }
 0x196   : > { %v639_v33 = vpop.f32.mrf.mxu1 }
 0x197   : > { %v643_v34 = vmul.f32 0.35355338, %v639_v33 }
 0x199   : > { %v644_v35 = vadd.f32 %v643_v34, %v494_v28 }
 0x19a   : > { %v521_v36 = vpop.xlane.xlu0 %520 }
 0x19b   : > { %v522_v37 = vsub.f32 %v518_v30, %v521_v36  ;;  %v645_v38 = vsel %vm497_vm1, %v644_v35, -inf }
 0x19c   : > { %646 = vmax.xlane.f32.xlu2 %v645_v38  ;;  %v955_v38 = vld [vmem:[%s1196_s7 + $0x8] sm:$0xff] }
 0x19d   : > { %v523_v39 = vmul.f32 1.442695, %v522_v37  ;;  %779 = vmatpush.bf16.msra.mxu1 %v955_v38 }
 0x19e   : > { %v641_v40 = vpop.f32.mrf.mxu1 }
 0x19f   : > { %980 = vpow2.f32 %v523_v39  ;;  %v954_v39 = vld [vmem:[%s1196_s7] sm:$0xff] }
 0x1a1   : > { %780 = vmatpush.bf16.msra.mxu1 %v954_v39 }
 0x1a5   : > { %v981_v41 = vpop.eup %980 }
 0x1a6   : > { %v525_v42 = vsel %vm497_vm1, %v981_v41, 0.0 }
 0x1a7   : > { %526 = vadd.xlane.f32.xlu0 %v525_v42 }
 0x1bb   : > { %686 = vrot.lane.b32.xlu0 %v1121_v15, %s1011_s23 }
 0x20f   : > { %v647_v44 = vpop.xlane.xlu2 %646 }
 0x210   : > { %v648_v45 = vsub.f32 %v644_v35, %v647_v44 }
 0x212   : > { %v649_v46 = vmul.f32 1.442695, %v648_v45  ;;  %v977_v45 = vld [vmem:[%s1197_s8] ss:$0 sm:$0xff] }
 0x214   : > { %982 = vpow2.f32 %v649_v46 }
 0x21a   : > { %v983_v47 = vpop.eup %982  ;;  %v527_v48 = vpop.xlane.xlu0 %526 }
 0x21b   : > { %984 = vrcp.f32 %v527_v48  ;;  %v651_v49 = vsel %vm497_vm1, %v983_v47, 0.0 }
 0x21c   : > { %652 = vadd.xlane.f32.xlu2 %v651_v49 }
 0x221   : > { %v985_v50 = vpop.eup %984 }
 0x222   : > { %v529_v51 = vmul.f32 %v985_v50, %v981_v41 }
 0x224   : > { %v530_v52 = vpack.c.bf16 %v529_v51, %v529_v51  ;;  %v1018_v51 = vmov 32.0  }
 0x226   : > { %932 = vmatmul.msk.bf16.vlgmr.msra.gmra.mxu3 %vm497_vm1, %v530_v52 }
 0x22d   : > { %v687_v53 = vpop.permute.xlu0 %686 }
 0x22e   : > { %v692_v54 = vsel %vm497_vm1, %v687_v53, 0 }
 0x22f   : > { %701 = vmatpush.bf16.xpose.msra.mxu3 %v692_v54 }
 0x236   : > { %933 = vmatmul.msk.bf16.vlgmr.msrb.gmra.mxu3 %vm497_vm1, %v557_v19 }
 0x246   : > { %937 = vmatmul.msk.bf16.vlgmr.msra.gmra.mxu3 %vm497_vm1, %v685_v43 }
 0x28f   : > { %v653_v17 = vpop.xlane.xlu2 %652 }
 0x2a9   : > { %v550_v55 = vpop.f32.mrf.mxu3 }
 0x2aa   : > { %554 = vst.msk [vmem:[#allocation2] sm:$0xff] %vm497_vm1, %v550_v55 }
 0x2b1   : > { %v552_v56 = vpop.f32.mrf.mxu3 }
 0x2b9   : > { %v575_v57 = vpop.f32.mrf.mxu3 }
 0x2ba   : > { %v579_v58 = vmul.f32 0.35355338, %v575_v57 }
 0x2bc   : > { %v580_v59 = vadd.f32 %v579_v58, %v494_v28 }
 0x2be   : > { %v581_v60 = vsel %vm497_vm1, %v580_v59, -inf }
 0x2bf   : > { %582 = vmax.xlane.f32.xlu1 %v581_v60 }
 0x2c1   : > { %v577_v61 = vpop.f32.mrf.mxu3 }
 0x2c9   : > { %v703_v62 = vpop.f32.mrf.mxu3 }
 0x2ca   : > { %v707_v63 = vmul.f32 0.35355338, %v703_v62 }
 0x2cc   : > { %v708_v0 = vadd.f32 %v707_v63, %v494_v28 }
 0x2ce   : > { %v709_v1 = vsel %vm497_vm1, %v708_v0, -inf }
 0x2cf   : > { %710 = vmax.xlane.f32.xlu0 %v709_v1 }
 0x2d1   : > { %v705_v2 = vpop.f32.mrf.mxu3 }
 0x2d8   : > { %593 = vrot.lane.b32.xlu1 %v1121_v15, %s1012_s28 }
 0x332   : > { %v583_v3 = vpop.xlane.xlu1 %582 }
 0x333   : > { %v584_v5 = vsub.f32 %v580_v59, %v583_v3 }
 0x335   : > { %v585_v6 = vmul.f32 1.442695, %v584_v5 }
 0x337   : > { %986 = vpow2.f32 %v585_v6 }
 0x33d   : > { %v987_v7 = vpop.eup %986 }
 0x33e   : > { %v587_v8 = vsel %vm497_vm1, %v987_v7, 0.0 }
 0x33f   : > { %588 = vadd.xlane.f32.xlu2 %v587_v8  ;;  %v978_v8 = vld [vmem:[%s1198_s9] ss:$0 sm:$0xff] }
 0x342   : > { %v711_v9 = vpop.xlane.xlu0 %710 }
 0x343   : > { %v712_v10 = vsub.f32 %v708_v0, %v711_v9 }
 0x345   : > { %v713_v11 = vmul.f32 1.442695, %v712_v10  ;;  %v979_v10 = vld [vmem:[%s1199_s10] ss:$0 sm:$0xff] }
 0x347   : > { %988 = vpow2.f32 %v713_v11 }
 0x348   : > { %990 = vrcp.f32 %v653_v17 }
 0x34a   : > { %v594_v12 = vpop.permute.xlu1 %593 }
 0x34b   : > { %v599_v13 = vsel %vm537_vm2, %v594_v12, 0 }
 0x34c   : > { %608 = vmatpush.bf16.msrb.mxu0 %v599_v13 }
 0x34d   : > { %v989_v14 = vpop.eup %988 }
 0x34e   : > { %v715_v16 = vsel %vm497_vm1, %v989_v14, 0.0  ;;  %v991_v19 = vpop.eup %990 }
 0x34f   : > { %716 = vadd.xlane.f32.xlu0 %v715_v16  ;;  %v655_v21 = vmul.f32 %v991_v19, %v983_v47 }
 0x351   : > { %v656_v26 = vpack.c.bf16 %v655_v21, %v655_v21 }
 0x357   : > { %657 = vrot.lane.b32.xlu2 %v1121_v15, %s1013_s29  ;;  %s415_s29 = scalar_lea.vmem %s1200_s11, %s1099_s27 }
 0x363   : > { %721 = vrot.lane.b32.xlu0 %v1121_v15, %s1014_s30 }
 0x3b2   : > { %v589_v18 = vpop.xlane.xlu2 %588 }
 0x3b3   : > { %992 = vrcp.f32 %v589_v18 }
 0x3b9   : > { %v993_v20 = vpop.eup %992 }
 0x3ba   : > { %v591_v22 = vmul.f32 %v993_v20, %v987_v7  ;;  %v658_v23 = vpop.permute.xlu2 %657 }
 0x3bb   : > { %v663_v24 = vsel %vm537_vm2, %v658_v23, 0 }
 0x3bc   : > { %672 = vmatpush.bf16.msrb.mxu2 %v663_v24  ;;  %v592_v25 = vpack.c.bf16 %v591_v22, %v591_v22 }
 0x3be   : > { %934 = vmatmul.msk.bf16.vlgmr.msrb.gmra.mxu0 %vm497_vm1, %v592_v25 }
 0x3bf   : > { %936 = vmatmul.msk.bf16.vlgmr.msrb.gmra.mxu2 %vm497_vm1, %v656_v26 }
 0x3c2   : > { %v717_v27 = vpop.xlane.xlu0 %716 }
 0x3c3   : > { %994 = vrcp.f32 %v717_v27 }
 0x3c4   : > { %996 = vrcp.f32 %v1018_v51 }
 0x3c9   : > { %v995_v15 = vpop.eup %994 }
 0x3ca   : > { %v719_v28 = vmul.f32 %v995_v15, %v989_v14  ;;  %v997_v52 = vpop.eup %996 }
 0x3cb   : > { %v791_v53 = vmul.f32 32.0, %v997_v52  ;;  %vm795_vm6 = vweird.f32 %v997_v52 }
 0x3cc   : > { %v720_v31 = vpack.c.bf16 %v719_v28, %v719_v28 }
 0x3cd   : > { %v792_v54 = vsub.f32 1.0, %v791_v53 }
 0x3cf   : > { %v793_v55 = vmul.f32 %v997_v52, %v792_v54 }
 0x3d1   : > { %v794_v56 = vadd.f32 %v997_v52, %v793_v55 }
 0x3d3   : > { %v796_v57 = vsel %vm795_vm6, %v997_v52, %v794_v56 }
 0x3d5   : > { %v722_v29 = vpop.permute.xlu0 %721 }
 0x3d6   : > { %v727_v30 = vsel %vm537_vm2, %v722_v29, 0 }
 0x3d7   : > { %736 = vmatpush.bf16.msra.mxu0 %v727_v30 }
 0x3da   : > { %938 = vmatmul.msk.bf16.vlgmr.msra.gmra.mxu0 %vm497_vm1, %v720_v31 }
 0x43b   : > { %v610_v32 = vpop.f32.mrf.mxu0 }
 0x43c   : > { %615 = vrot.lane.b32.xlu1 %v610_v32, %s1015_s12 }
 0x442   : > { %v674_v33 = vpop.f32.mrf.mxu2 }
 0x443   : > { %v612_v34 = vpop.f32.mrf.mxu0 }
 0x444   : > { %679 = vrot.lane.b32.xlu1 %v674_v33, %s1016_s13 }
 0x44a   : > { %v676_v35 = vpop.f32.mrf.mxu2 }
 0x457   : > { %v738_v36 = vpop.f32.mrf.mxu0 }
 0x458   : > { %743 = vrot.lane.b32.xlu2 %v738_v36, %s1017_s14 }
 0x45f   : > { %v740_v37 = vpop.f32.mrf.mxu0 }
 0x4ae   : > { %v616_v40 = vpop.permute.xlu1 %615 }
 0x4af   : > { %619 = vst.msk [vmem:[#allocation2] sm:$0xff] %vm618_vm3, %v616_v40 }
 0x4b2   : > { %v744_v42 = vpop.permute.xlu2 %743 }
 0x4b6   : > { %v680_v41 = vpop.permute.xlu1 %679 }
 0x4b7   : > { %683 = vst.msk [vmem:[#allocation2] sm:$0xff] %vm682_vm4, %v680_v41 }
 0x4b8   : > { %747 = vst.msk [vmem:[#allocation2] sm:$0xff] %vm746_vm5, %v744_v42 }
 0x4bf   : > { %v748_v43 = vld [vmem:[#allocation2] sm:$0xff] }
 0x4c0   : > { %v749_v44 = vpack.c.bf16 %v748_v43, %v748_v43 }
 0x4c2   : > { %947 = vmatmul.msk.bf16.vlgmr.msra.gmra.mxu1 %vm441_vm0, %v749_v44 }
 0x53f   : > { %v782_v46 = vpop.f32.mrf.mxu1 }
 0x540   : > { %v783_v47 = vadd.f32 %v977_v45, %v782_v46 }
 0x542   : > { %v786_v48 = vadd.f32 %v783_v47, %v1105_v4 }
 0x544   : > { %v787_v49 = vsel %vm441_vm0, %v786_v48, 0.0 }
 0x545   : > { %788 = vadd.xlane.f32.xlu0 %v787_v49 }
 0x547   : > { %v784_v50 = vpop.f32.mrf.mxu1 }
 0x5b8   : > { %v789_v58 = vpop.xlane.xlu0 %788 }
 0x5b9   : > { %v797_v59 = vmul.f32 %v796_v57, %v789_v58 }
 0x5bb   : > { %v798_v60 = vsub.f32 %v786_v48, %v797_v59 }
 0x5bd   : > { %v799_v61 = vmul.f32 %v798_v60, %v798_v60 }
 0x5bf   : > { %v800_v62 = vsel %vm441_vm0, %v799_v61, 0.0 }
 0x5c0   : > { %801 = vadd.xlane.f32.xlu1 %v800_v62 }
 0x633   : > { %v802_v4 = vpop.xlane.xlu1 %801 }
 0x634   : > { %v803_v63 = vmul.f32 %v802_v4, %v796_v57 }
 0x636   : > { %v804_v0 = vadd.f32 1e-05, %v803_v63 }
 0x638   : > { %998 = vrsqrt.f32 %v804_v0  ;;  %vm811_vm8 = vweird.f32 %v804_v0 }
 0x63e   : > { %v999_v1 = vpop.eup %998 }
 0x63f   : > { %v806_v2 = vmul.f32 %v999_v1, %v804_v0  ;;  %vm812_vm7 = vweird.f32 %v999_v1 }
 0x640   : > { %vm813_vm9 = vmor %vm811_vm8, %vm812_vm7 }
 0x641   : > { %v807_v3 = vmul.f32 %v999_v1, %v806_v2 }
 0x643   : > { %v808_v5 = vmul.f32 0.5, %v807_v3 }
 0x645   : > { %v809_v6 = vsub.f32 1.5, %v808_v5 }
 0x647   : > { %v810_v7 = vmul.f32 %v999_v1, %v809_v6 }
 0x649   : > { %v814_v9 = vsel %vm813_vm9, %v999_v1, %v810_v7 }
 0x64a   : > { %v815_v11 = vmul.f32 %v814_v9, %v798_v60 }
 0x64c   : > { %v820_v12 = vmul.f32 %v978_v8, %v815_v11 }
 0x64e   : > { %v825_v13 = vadd.f32 %v979_v10, %v820_v12 }
 0x650   : > { %826 = vst.msk [vmem:[%s415_s29] sm:$0xff] %vm441_vm0, %v825_v13 }
 0x651 PF: > { %s21_s17 = sadd.s32 1, %s1006_s17  }
 0x652   : > { %p18_p4 = scmp.ge.s32.totalorder %s21_s17, 4  }
 0x654   :  { %20 = sbr.rel (!%p18_p4) target bundleno = 1 (0x1), region = 100 }

// kernel: decoder_forward.11
= control target key start
LH: loop header
LB: loop body
LE: loop exit
PB: predicated region body
PF: predicated region fallthrough
CT: control target
= control target key end

     0   :  { %16 = vsyncpa [#allocation4], 0  ;;  %s1349_s0 = inlined_call_operand.vmem [shape: f32[2,8,32], index: 0, kind: input, shape index: {}]   ;;  %s1350_s1 = inlined_call_operand.vmem [shape: f32[2,8,32], index: 1, kind: input, shape index: {}]   ;;  %s1351_s2 = inlined_call_operand.vmem [shape: bf16[32,32], index: 2, kind: input, shape index: {}]   ;;  %s1352_s3 = inlined_call_operand.vmem [shape: f32[1,32], index: 3, kind: input, shape index: {}]   ;;  %s1353_s4 = inlined_call_operand.vmem [shape: bf16[32,64], index: 4, kind: input, shape index: {}]   ;;  %s1354_s5 = inlined_call_operand.vmem [shape: f32[1,64], index: 5, kind: input, shape index: {}]   ;;  %s1355_s6 = inlined_call_operand.vmem [shape: f32[2,8,8], index: 6, kind: input, shape index: {}]   ;;  %s1356_s7 = inlined_call_operand.vmem [shape: bf16[32,32], index: 7, kind: input, shape index: {}]   ;;  %s1357_s8 = inlined_call_operand.vmem [shape: f32[1,32], index: 8, kind: input, shape index: {}]   ;;  %s1358_s9 = inlined_call_operand.hbm [shape: f32[1,32], index: 9, kind: input, shape index: {}]   ;;  %s1359_s10 = inlined_call_operand.hbm [shape: f32[1,32], index: 10, kind: input, shape index: {}]   ;;  %s1360_s11 = inlined_call_operand.vmem [shape: f32[2,8,32], index: 11, kind: output, shape index: {}]  }
   0x1   :  { %17 = vsyncpa [#allocation6], 0  ;;  %s1226_s17 = smov 0  }
   0x2 LB: > { %s330_s20 = sshll.u32 %s1358_s9, 4  ;;  %s956_s21 = sadd.s32 4294967295, %s1151_s17   ;;  %s1151_s17 = sphi %s1226_s17, %s23_s17   ;;  %s331_s20 = int_to_ptr.hbm [resolvable:$true] %s330_s20 }
   0x3   : > { %p958_p0 = scmp.ge.s32.totalorder %s1151_s17, 1  ;;  %p300_p1 = scmp.lt.s32.totalorder %s1151_s17, 3 }
   0x4   : > { %p1027_p2 = scmp.eq.s32.totalorder %s956_s21, 0  ;;  %s1153_s23 = smov [#allocation3]  }
   0x5   : > { %p1237_p3 = pnand %p958_p0, %p300_p1  ;;  %s332_s24 = sshll.u32 %s1153_s23, 4  ;;  %s333_s24 = int_to_ptr.vmem [resolvable:$true] %s332_s24 }
   0x6   : > { %s342_s27 = sshll.u32 %s1359_s10, 4  ;;  %s1154_s28 = smov [#allocation5]   ;;  %s343_s27 = int_to_ptr.hbm [resolvable:$true] %s342_s27 }
   0x7   : > { %p1020_p4 = pneg %p1237_p3  ;;  %s344_s29 = sshll.u32 %s1154_s28, 4  ;;  %s345_s29 = int_to_ptr.vmem [resolvable:$true] %s344_s29 }
   0x8   : > { %378 = sbr.rel (%p1237_p3) target bundleno = 1622 (0x656), region = 64 }
   0x9   : > { %p1021_p5 = pnand %p1027_p2, %p1020_p4 }
   0xb   : > { %1023 = dma.hbm_to_vmem [thread:$0]  (!%p1021_p5), %s331_s20, 16, %s333_s24, [#allocation4]  }
   0xc   : > { %1026 = dma.hbm_to_vmem [thread:$0]  (!%p1021_p5), %s343_s27, 16, %s345_s29, [#allocation6]  }
   0xd   : > { %1142 = dma.done.wait (%p1027_p2), [#allocation4], 16  }
   0xe   : > { %1144 = vsyncadd (%p1027_p2), [#allocation4], 4294967280 }
   0xf   : > { %1146 = dma.done.wait (%p1027_p2), [#allocation6], 16  }
  0x10   : > { %1148 = vsyncadd (%p1027_p2), [#allocation6], 4294967280  ;;  %p430_p6 = scmp.lt.s32.totalorder %s956_s21, 1  ;;  %v1007_v0 = vld [vmem:[%s1351_s2 + $0x8] sm:$0xff]  ;;  %v1006_v2 = vld [vmem:[%s1351_s2] sm:$0xff]  ;;  %vm471_vm0 = vcmask 261120  }
  0x11   : > { %v1009_v1 = vld [vmem:[%s1353_s4 + $0x8] sm:$0xff]  ;;  %v1008_v3 = vld [vmem:[%s1353_s4] sm:$0xff]  ;;  %481 = vmatpush.bf16.msra.mxu0 %v1007_v0  ;;  %vm527_vm1 = vcmask 64512   ;;  %s1155_s13 = smov 96   ;;  %s1157_s15 = smov 112   ;;  %vm567_vm2 = vcmask 1043456  }
  0x12   : > { %s1363_s21 = smov (!%p430_p6, %s956_s21), 1  ;;  %517 = vmatpush.bf16.msra.mxu1 %v1009_v1  ;;  %v1052_v8 = vld [vmem:[%s1352_s3] ss:$0 sm:$0xff]  ;;  %s1158_s16 = smov 104   ;;  %vm648_vm3 = vcmask 130112   ;;  %vm712_vm4 = vcmask 195712  }
  0x13   : > { %s1253_s30 = sshll.u32 %s1363_s21, 3  ;;  %v1053_v9 = vld [vmem:[%s1354_s5] ss:$0 sm:$0xff]  ;;  %s1159_s22 = smov 88   ;;  %vm776_vm5 = vcmask 261312  }
  0x14   : > { %s433_s14 = scalar_lea.vmem %s1349_s0, %s1253_s30  ;;  %s437_s18 = scalar_lea.vmem %s1350_s1, %s1253_s30 }
  0x15   : > { %v1275_v4 = vld [vmem:[%s433_s14] sm:$0xff]  ;;  %482 = vmatpush.bf16.msra.mxu0 %v1006_v2  ;;  %s1156_s14 = smov 120   ;;  %s441_s20 = scalar_lea.vmem %s1355_s6, %s1253_s30 }
  0x16   : > { %v448_v5 = vld [vmem:[%s437_s18] sm:$0xff]  ;;  %v449_v6 = vpack.c.bf16 %v1275_v4, %v1275_v4  ;;  %518 = vmatpush.bf16.msra.mxu1 %v1008_v3  ;;  %s1160_s23 = smov 80   ;;  %s1161_s21 = smov 72  }
  0x17   : > { %v450_v7 = vpack.c.bf16 %v448_v5, %v448_v5  ;;  %v524_v28 = vld [vmem:[%s441_s20] sm:$0xff]  ;;  %s1162_s24 = smov 8   ;;  %s1163_s25 = smov 16  }
  0x18   : > { %977 = vmatmul.msk.bf16.vlgmr.msra.gmra.mxu0 %vm471_vm0, %v449_v6  ;;  %s1164_s26 = smov 24   ;;  %s445_s18 = scalar_lea.vmem %s1360_s11, %s1253_s30 }
  0x19   : > { %986 = vmatmul.msk.bf16.vlgmr.msra.gmra.mxu1 %vm471_vm0, %v450_v7 }
  0x95   : > { %v484_v10 = vpop.f32.mrf.mxu0 }
  0x96   : > { %v520_v11 = vpop.f32.mrf.mxu1  ;;  %v485_v12 = vadd.f32 %v1052_v8, %v484_v10 }
  0x97   : > { %v521_v13 = vadd.f32 %v1053_v9, %v520_v11 }
  0x98   : > { %v525_v14 = vpack.c.bf16 %v485_v12, %v485_v12 }
  0x99   : > { %v1287_v15 = vpack.c.bf16 %v521_v13, %v521_v13 }
  0x9a   : > { %586 = vrot.lane.b32.xlu2 %v525_v14, %s1156_s14 }
  0x9b   : > { %562 = vrot.lane.b32.xlu1 %v1287_v15, %s1155_s13  ;;  %v532_v16 = vsel %vm527_vm1, %v1287_v15, 0 }
  0x9c   : > { %541 = vmatpush.bf16.xpose.msra.mxu2 %v532_v16 }
  0x9d   : > { %v486_v17 = vpop.f32.mrf.mxu0 }
  0x9e   : > { %v522_v18 = vpop.f32.mrf.mxu1 }
  0xa2   : > { %652 = vrot.lane.b32.xlu2 %v1287_v15, %s1157_s15 }
  0xa3   : > { %588 = vrot.lane.b32.xlu1 %v1287_v15, %s1156_s14  ;;  %987 = vmatmul.msk.bf16.vlgmr.msra.gmra.mxu2 %vm527_vm1, %v525_v14 }
  0xaa   : > { %714 = vrot.lane.b32.xlu2 %v525_v14, %s1158_s16 }
  0xab   : > { %650 = vrot.lane.b32.xlu1 %v525_v14, %s1157_s15 }
  0xf4   : > { %v587_v19 = vpop.permute.xlu2 %586 }
  0xfc   : > { %v653_v20 = vpop.permute.xlu2 %652 }
  0xfd   : > { %v658_v21 = vsel %vm527_vm1, %v653_v20, 0 }
  0xfe   : > { %667 = vmatpush.bf16.xpose.msrb.mxu1 %v658_v21 }
 0x104   : > { %v715_v43 = vpop.permute.xlu2 %714 }
 0x10d   : > { %v563_v22 = vpop.permute.xlu1 %562 }
 0x10e   : > { %v569_v23 = vsel %vm567_vm2, %v563_v22, 0 }
 0x10f   : > { %578 = vmatpush.bf16.msra.mxu3 %v569_v23 }
 0x115   : > { %v589_v24 = vpop.permute.xlu1 %588 }
 0x116   : > { %v594_v25 = vsel %vm527_vm1, %v589_v24, 0 }
 0x117   : > { %603 = vmatpush.bf16.xpose.msrb.mxu3 %v594_v25 }
 0x11d   : > { %v651_v26 = vpop.permute.xlu1 %650 }
 0x11e   : > { %991 = vmatmul.msk.bf16.vlgmr.msrb.gmra.mxu1 %vm527_vm1, %v651_v26 }
 0x126   : > { %v543_v27 = vpop.f32.mrf.mxu2 }
 0x127   : > { %v547_v29 = vmul.f32 0.35355338, %v543_v27 }
 0x129   : > { %v548_v30 = vadd.f32 %v547_v29, %v524_v28 }
 0x12b   : > { %v549_v31 = vsel %vm527_vm1, %v548_v30, -inf }
 0x12c   : > { %550 = vmax.xlane.f32.xlu0 %v549_v31 }
 0x12e   : > { %v545_v32 = vpop.f32.mrf.mxu2 }
 0x19b   : > { %v669_v33 = vpop.f32.mrf.mxu1 }
 0x19c   : > { %v673_v34 = vmul.f32 0.35355338, %v669_v33 }
 0x19e   : > { %v674_v35 = vadd.f32 %v673_v34, %v524_v28 }
 0x19f   : > { %v551_v36 = vpop.xlane.xlu0 %550 }
 0x1a0   : > { %v675_v37 = vsel %vm527_vm1, %v674_v35, -inf  ;;  %v552_v38 = vsub.f32 %v548_v30, %v551_v36 }
 0x1a1   : > { %676 = vmax.xlane.f32.xlu2 %v675_v37 }
 0x1a2   : > { %v553_v39 = vmul.f32 1.442695, %v552_v38  ;;  %v1011_v38 = vld [vmem:[%s1356_s7 + $0x8] sm:$0xff] }
 0x1a3   : > { %v671_v40 = vpop.f32.mrf.mxu1  ;;  %809 = vmatpush.bf16.msra.mxu1 %v1011_v38 }
 0x1a4   : > { %1057 = vpow2.f32 %v553_v39  ;;  %v1010_v39 = vld [vmem:[%s1356_s7] sm:$0xff] }
 0x1a7   : > { %810 = vmatpush.bf16.msra.mxu1 %v1010_v39 }
 0x1aa   : > { %v1058_v41 = vpop.eup %1057 }
 0x1ab   : > { %v555_v42 = vsel %vm527_vm1, %v1058_v41, 0.0 }
 0x1ac   : > { %556 = vadd.xlane.f32.xlu0 %v555_v42 }
 0x1c0   : > { %716 = vrot.lane.b32.xlu0 %v1287_v15, %s1158_s16 }
 0x214   : > { %v677_v44 = vpop.xlane.xlu2 %676 }
 0x215   : > { %v678_v45 = vsub.f32 %v674_v35, %v677_v44 }
 0x217   : > { %v679_v46 = vmul.f32 1.442695, %v678_v45  ;;  %v1054_v45 = vld [vmem:[%s1357_s8] ss:$0 sm:$0xff] }
 0x219   : > { %1059 = vpow2.f32 %v679_v46 }
 0x21f   : > { %v1060_v47 = vpop.eup %1059  ;;  %v557_v48 = vpop.xlane.xlu0 %556 }
 0x220   : > { %v681_v49 = vsel %vm527_vm1, %v1060_v47, 0.0  ;;  %1061 = vrcp.f32 %v557_v48 }
 0x221   : > { %682 = vadd.xlane.f32.xlu2 %v681_v49 }
 0x226   : > { %v1062_v50 = vpop.eup %1061 }
 0x227   : > { %v559_v51 = vmul.f32 %v1062_v50, %v1058_v41 }
 0x229   : > { %v560_v52 = vpack.c.bf16 %v559_v51, %v559_v51  ;;  %v1165_v51 = vmov 32.0  }
 0x22b   : > { %988 = vmatmul.msk.bf16.vlgmr.msra.gmra.mxu3 %vm527_vm1, %v560_v52 }
 0x232   : > { %v717_v53 = vpop.permute.xlu0 %716 }
 0x233   : > { %v722_v54 = vsel %vm527_vm1, %v717_v53, 0 }
 0x234   : > { %731 = vmatpush.bf16.xpose.msra.mxu3 %v722_v54 }
 0x23b   : > { %989 = vmatmul.msk.bf16.vlgmr.msrb.gmra.mxu3 %vm527_vm1, %v587_v19 }
 0x24b   : > { %993 = vmatmul.msk.bf16.vlgmr.msra.gmra.mxu3 %vm527_vm1, %v715_v43 }
 0x294   : > { %v683_v17 = vpop.xlane.xlu2 %682 }
 0x2ae   : > { %v580_v55 = vpop.f32.mrf.mxu3 }
 0x2af   : > { %584 = vst.msk [vmem:[#allocation2] sm:$0xff] %vm527_vm1, %v580_v55 }
 0x2b6   : > { %v582_v56 = vpop.f32.mrf.mxu3 }
 0x2be   : > { %v605_v57 = vpop.f32.mrf.mxu3 }
 0x2bf   : > { %v609_v58 = vmul.f32 0.35355338, %v605_v57 }
 0x2c1   : > { %v610_v59 = vadd.f32 %v609_v58, %v524_v28 }
 0x2c3   : > { %v611_v60 = vsel %vm527_vm1, %v610_v59, -inf }
 0x2c4   : > { %612 = vmax.xlane.f32.xlu1 %v611_v60 }
 0x2c6   : > { %v607_v61 = vpop.f32.mrf.mxu3 }
 0x2ce   : > { %v733_v62 = vpop.f32.mrf.mxu3 }
 0x2cf   : > { %v737_v63 = vmul.f32 0.35355338, %v733_v62 }
 0x2d1   : > { %v738_v0 = vadd.f32 %v737_v63, %v524_v28 }
 0x2d3   : > { %v739_v1 = vsel %vm527_vm1, %v738_v0, -inf }
 0x2d4   : > { %740 = vmax.xlane.f32.xlu0 %v739_v1 }
 0x2d6   : > { %v735_v2 = vpop.f32.mrf.mxu3 }
 0x2dd   : > { %623 = vrot.lane.b32.xlu1 %v1287_v15, %s1159_s22 }
 0x337   : > { %v613_v3 = vpop.xlane.xlu1 %612 }
 0x338   : > { %v614_v5 = vsub.f32 %v610_v59, %v613_v3 }
 0x33a   : > { %v615_v6 = vmul.f32 1.442695, %v614_v5 }
 0x33c   : > { %1063 = vpow2.f32 %v615_v6 }
 0x342   : > { %v1064_v7 = vpop.eup %1063 }
 0x343   : > { %v617_v8 = vsel %vm527_vm1, %v1064_v7, 0.0 }
 0x344   : > { %618 = vadd.xlane.f32.xlu2 %v617_v8  ;;  %v1055_v8 = vld [vmem:[#allocation3] ss:$0 sm:$0xff] }
 0x347   : > { %v741_v9 = vpop.xlane.xlu0 %740 }
 0x348   : > { %v742_v10 = vsub.f32 %v738_v0, %v741_v9 }
 0x34a   : > { %v743_v11 = vmul.f32 1.442695, %v742_v10  ;;  %v1056_v10 = vld [vmem:[#allocation5] ss:$0 sm:$0xff] }
 0x34c   : > { %1065 = vpow2.f32 %v743_v11 }
 0x34d   : > { %1067 = vrcp.f32 %v683_v17 }
 0x34f   : > { %v624_v12 = vpop.permute.xlu1 %623 }
 0x350   : > { %v629_v13 = vsel %vm567_vm2, %v624_v12, 0 }
 0x351   : > { %638 = vmatpush.bf16.msrb.mxu0 %v629_v13 }
 0x352   : > { %v1066_v14 = vpop.eup %1065 }
 0x353   : > { %v745_v16 = vsel %vm527_vm1, %v1066_v14, 0.0  ;;  %v1068_v19 = vpop.eup %1067 }
 0x354   : > { %746 = vadd.xlane.f32.xlu0 %v745_v16  ;;  %v685_v21 = vmul.f32 %v1068_v19, %v1060_v47 }
 0x356   : > { %v686_v26 = vpack.c.bf16 %v685_v21, %v685_v21 }
 0x35c   : > { %687 = vrot.lane.b32.xlu2 %v1287_v15, %s1160_s23 }
 0x368   : > { %751 = vrot.lane.b32.xlu0 %v1287_v15, %s1161_s21 }
 0x3b7   : > { %v619_v18 = vpop.xlane.xlu2 %618 }
 0x3b8   : > { %1069 = vrcp.f32 %v619_v18 }
 0x3be   : > { %v1070_v20 = vpop.eup %1069 }
 0x3bf   : > { %v621_v22 = vmul.f32 %v1070_v20, %v1064_v7  ;;  %v688_v23 = vpop.permute.xlu2 %687 }
 0x3c0   : > { %v693_v24 = vsel %vm567_vm2, %v688_v23, 0 }
 0x3c1   : > { %702 = vmatpush.bf16.msrb.mxu2 %v693_v24  ;;  %v622_v25 = vpack.c.bf16 %v621_v22, %v621_v22 }
 0x3c3   : > { %990 = vmatmul.msk.bf16.vlgmr.msrb.gmra.mxu0 %vm527_vm1, %v622_v25 }
 0x3c4   : > { %992 = vmatmul.msk.bf16.vlgmr.msrb.gmra.mxu2 %vm527_vm1, %v686_v26 }
 0x3c7   : > { %v747_v27 = vpop.xlane.xlu0 %746 }
 0x3c8   : > { %1071 = vrcp.f32 %v747_v27 }
 0x3c9   : > { %1073 = vrcp.f32 %v1165_v51 }
 0x3ce   : > { %v1072_v15 = vpop.eup %1071 }
 0x3cf   : > { %v749_v28 = vmul.f32 %v1072_v15, %v1066_v14  ;;  %v1074_v52 = vpop.eup %1073 }
 0x3d0   : > { %v821_v53 = vmul.f32 32.0, %v1074_v52  ;;  %vm825_vm6 = vweird.f32 %v1074_v52 }
 0x3d1   : > { %v750_v31 = vpack.c.bf16 %v749_v28, %v749_v28 }
 0x3d2   : > { %v822_v54 = vsub.f32 1.0, %v821_v53 }
 0x3d4   : > { %v823_v55 = vmul.f32 %v1074_v52, %v822_v54 }
 0x3d6   : > { %v824_v56 = vadd.f32 %v1074_v52, %v823_v55 }
 0x3d8   : > { %v826_v57 = vsel %vm825_vm6, %v1074_v52, %v824_v56 }
 0x3da   : > { %v752_v29 = vpop.permute.xlu0 %751 }
 0x3db   : > { %v757_v30 = vsel %vm567_vm2, %v752_v29, 0 }
 0x3dc   : > { %766 = vmatpush.bf16.msra.mxu0 %v757_v30 }
 0x3df   : > { %994 = vmatmul.msk.bf16.vlgmr.msra.gmra.mxu0 %vm527_vm1, %v750_v31 }
 0x440   : > { %v640_v32 = vpop.f32.mrf.mxu0 }
 0x441   : > { %645 = vrot.lane.b32.xlu1 %v640_v32, %s1162_s24 }
 0x447   : > { %v704_v33 = vpop.f32.mrf.mxu2 }
 0x448   : > { %v642_v34 = vpop.f32.mrf.mxu0 }
 0x449   : > { %709 = vrot.lane.b32.xlu1 %v704_v33, %s1163_s25 }
 0x44f   : > { %v706_v35 = vpop.f32.mrf.mxu2 }
 0x45c   : > { %v768_v36 = vpop.f32.mrf.mxu0 }
 0x45d   : > { %773 = vrot.lane.b32.xlu2 %v768_v36, %s1164_s26 }
 0x464   : > { %v770_v37 = vpop.f32.mrf.mxu0 }
 0x4b3   : > { %v646_v40 = vpop.permute.xlu1 %645 }
 0x4b4   : > { %649 = vst.msk [vmem:[#allocation2] sm:$0xff] %vm648_vm3, %v646_v40 }
 0x4b7   : > { %v774_v42 = vpop.permute.xlu2 %773 }
 0x4bb   : > { %v710_v41 = vpop.permute.xlu1 %709 }
 0x4bc   : > { %713 = vst.msk [vmem:[#allocation2] sm:$0xff] %vm712_vm4, %v710_v41 }
 0x4bd   : > { %777 = vst.msk [vmem:[#allocation2] sm:$0xff] %vm776_vm5, %v774_v42 }
 0x4c4   : > { %v778_v43 = vld [vmem:[#allocation2] sm:$0xff] }
 0x4c5   : > { %v779_v44 = vpack.c.bf16 %v778_v43, %v778_v43 }
 0x4c7   : > { %1003 = vmatmul.msk.bf16.vlgmr.msra.gmra.mxu1 %vm471_vm0, %v779_v44 }
 0x544   : > { %v812_v46 = vpop.f32.mrf.mxu1 }
 0x545   : > { %v813_v47 = vadd.f32 %v1054_v45, %v812_v46 }
 0x547   : > { %v816_v48 = vadd.f32 %v813_v47, %v1275_v4 }
 0x549   : > { %v817_v49 = vsel %vm471_vm0, %v816_v48, 0.0 }
 0x54a   : > { %818 = vadd.xlane.f32.xlu0 %v817_v49 }
 0x54c   : > { %v814_v50 = vpop.f32.mrf.mxu1 }
 0x5bd   : > { %v819_v58 = vpop.xlane.xlu0 %818 }
 0x5be   : > { %v827_v59 = vmul.f32 %v826_v57, %v819_v58 }
 0x5c0   : > { %v828_v60 = vsub.f32 %v816_v48, %v827_v59 }
 0x5c2   : > { %v829_v61 = vmul.f32 %v828_v60, %v828_v60 }
 0x5c4   : > { %v830_v62 = vsel %vm471_vm0, %v829_v61, 0.0 }
 0x5c5   : > { %831 = vadd.xlane.f32.xlu1 %v830_v62 }
 0x638   : > { %v832_v4 = vpop.xlane.xlu1 %831 }
 0x639   : > { %v833_v63 = vmul.f32 %v832_v4, %v826_v57 }
 0x63b   : > { %v834_v0 = vadd.f32 1e-05, %v833_v63 }
 0x63d   : > { %1075 = vrsqrt.f32 %v834_v0  ;;  %vm841_vm8 = vweird.f32 %v834_v0 }
 0x643   : > { %v1076_v1 = vpop.eup %1075 }
 0x644   : > { %v836_v2 = vmul.f32 %v1076_v1, %v834_v0  ;;  %vm842_vm7 = vweird.f32 %v1076_v1 }
 0x645   : > { %vm843_vm9 = vmor %vm841_vm8, %vm842_vm7 }
 0x646   : > { %v837_v3 = vmul.f32 %v1076_v1, %v836_v2 }
 0x648   : > { %v838_v5 = vmul.f32 0.5, %v837_v3 }
 0x64a   : > { %v839_v6 = vsub.f32 1.5, %v838_v5 }
 0x64c   : > { %v840_v7 = vmul.f32 %v1076_v1, %v839_v6 }
 0x64e   : > { %v844_v9 = vsel %vm843_vm9, %v1076_v1, %v840_v7 }
 0x64f   : > { %v845_v11 = vmul.f32 %v844_v9, %v828_v60 }
 0x651   : > { %v850_v12 = vmul.f32 %v1055_v8, %v845_v11 }
 0x653   : > { %v855_v13 = vadd.f32 %v1056_v10, %v850_v12 }
 0x655   : > { %856 = vst.msk [vmem:[%s445_s18] sm:$0xff] %vm471_vm0, %v855_v13 }
 0x656 PF: > { %s23_s17 = sadd.s32 1, %s1151_s17  }
 0x657   : > { %p20_p7 = scmp.ge.s32.totalorder %s23_s17, 4  }
 0x659   :  { %22 = sbr.rel (!%p20_p7) target bundleno = 2 (0x2), region = 109 }
 0x65e   :  { %876 = vsyncpa [#allocation4], 1 }
 0x65f   :  { %878 = vsyncpa [#allocation4 + $0x1], 1 }
 0x660   :  { %879 = vsyncpa [#allocation6], 1 }

</bundles_post_ra>
